<compile_context>
chip_gen: v7x
topology: tpu7x:2x2x1
jax: 0.10.0
libtpu: 0.0.40
codegen_flags: <defaults>
</compile_context>

<pallas_src>
import functools

import jax
import jax.numpy as jnp
from jax.experimental import pallas as pl
from jax.experimental.pallas import tpu as pltpu

POS_MARGIN = 0.0   # ContrastiveLoss defaults
NEG_MARGIN = 1.0


# ----------------------------------------------------------------------------
# Pallas kernel: negative-pair contrastive hinge over all label-mismatched pairs
# of the (pre-normalized, pre-transposed) embedding matrix, with per-row-block
# lane-vector partial sums / counts.
# ----------------------------------------------------------------------------
def _neg_contrastive_kernel(rows_ref, cols_ref, nsum_ref, ncnt_ref, *,
                            num_pos, tm, tn, total_m, col_resident):
    i = pl.program_id(0)          # row-block axis ("parallel", megacore-shardable)
    j = pl.program_id(1)          # column-block axis ("arbitrary", reduction)

    # Output blocks are resident across j (index_map ignores j): init once.
    @pl.when(j == 0)
    def _():
        nsum_ref[...] = jnp.zeros_like(nsum_ref)
        ncnt_ref[...] = jnp.zeros_like(ncnt_ref)

    # Column operand: either a streamed (D, tn) block or an in-kernel slice of the
    # VMEM-resident (D, M) matrix (fetched once for the whole grid).
    if col_resident:
        if tn == total_m:
            cols = cols_ref[...]
        else:
            off = pl.multiple_of(j * tn, 128)         # tn % 128 == 0 in this path
            cols = cols_ref[:, pl.ds(off, tn)]
    else:
        cols = cols_ref[...]

    # MXU gram of unit-norm embeddings -> squared distance -> distance (EUP rsqrt).
    gram = jnp.dot(rows_ref[...], cols, preferred_element_type=jnp.float32)  # (tm, tn)
    s = jnp.maximum(2.0 - 2.0 * gram, 0.0)
    d = s * jax.lax.rsqrt(s + 1e-12)                  # sqrt(s), stays on the EUP slot

    hinge = jnp.maximum(NEG_MARGIN - d, 0.0)          # negative hinge loss
    # nonzero <=> d < margin <=> gram > 1 - margin^2/2 : no dependency on the rsqrt.
    nz = (gram > (1.0 - 0.5 * NEG_MARGIN * NEG_MARGIN)).astype(jnp.float32)

    def accum(loss_tile, cnt_tile):
        # Reduce only along the sublane (row) axis -> lane-dense (1, tn) partials,
        # accumulated element-wise into the resident output block.  Final
        # cross-lane reduction happens in the wrapper.  Per-lane counts are
        # <= tm * (M/tn) << 2^24, so f32 accumulation is exact.
        nsum_ref[...] += jnp.sum(loss_tile, axis=0, keepdims=True)[None]
        ncnt_ref[...] += jnp.sum(cnt_tile, axis=0, keepdims=True)[None]

    # Scalar (SMEM) test: can this tile intersect the self diagonal (delta == 0)
    # or the positive-pair diagonals (delta == +-num_pos)?  delta = row - col.
    lo = i * tm - (j * tn + tn - 1)
    hi = i * tm + tm - 1 - j * tn

    def hits(v):
        return jnp.logical_and(lo <= v, v <= hi)

    needs_mask = jnp.logical_or(hits(0),
                                jnp.logical_or(hits(num_pos), hits(-num_pos)))

    @pl.when(needs_mask)
    def _():
        # Slow path (O(1/ncol) of tiles): exclude self pairs and positive pairs.
        # Hoisted: single iota difference + one scalar-broadcast add.
        base = (jax.lax.broadcasted_iota(jnp.int32, (tm, tn), 0)
                - jax.lax.broadcasted_iota(jnp.int32, (tm, tn), 1))
        delta = base + (i * tm - j * tn)
        excl = jnp.logical_or(delta == 0, jnp.abs(delta) == num_pos)
        keep = jnp.logical_not(excl).astype(jnp.float32)
        accum(hinge * keep, nz * keep)

    @pl.when(jnp.logical_not(needs_mask))
    def _():
        # Fast path: every pair in the tile is a negative.
        accum(hinge, nz)


def _pick_tile(m, target, align):
    """Largest tile <= target that divides m and is a multiple of `align`;
    falls back to the full extent m (always legal as a BlockSpec dim)."""
    t = min(target, m)
    t -= t % align
    while t >= align:
        if m % t == 0:
            return t
        t -= align
    return m


def contrastive_loss_pallas(feat1, feat2, tm=512, tn=1024,
                            mxu_dtype=jnp.bfloat16):
    """ContrastiveLoss(all_feat, labels=[0..N-1, 0..N-1]) with feat1, feat2: (N, D)."""
    N, D = feat1.shape
    assert feat2.shape == (N, D)
    M = 2 * N

    # L2-normalize ONCE in f32 (LpDistance(normalize_embeddings=True) default).
    all_feat = jnp.concatenate([feat1, feat2], axis=0).astype(jnp.float32)
    normed = all_feat * jax.lax.rsqrt(
        jnp.sum(all_feat * all_feat, axis=-1, keepdims=True) + 1e-12)

    # --- positive-pair term: exact f32, outside the MxM tile loop --------------
    # Positives are exactly the pairs (r, r±N): N row-wise distances, each counted
    # twice by the symmetric pair enumeration (the factor cancels in the average).
    diff = normed[:N] - normed[N:]
    pos_d = jnp.sqrt(jnp.sum(diff * diff, axis=-1))
    pos_sum = jnp.sum(pos_d)                                   # pos_margin == 0
    pos_cnt = jnp.sum((pos_d > 0.0).astype(jnp.float32))
    pos_avg = jnp.where(pos_cnt > 0.0, pos_sum / jnp.maximum(pos_cnt, 1.0), 0.0)

    # --- negative-pair term: Pallas kernel over the MxM pair grid --------------
    feat_rows = normed.astype(mxu_dtype)          # (M, D)
    feat_cols = feat_rows.T                       # (D, M), lane-dense in M

    # TODO(synk): real sampler output N is data-dependent; if padding is ever
    # needed to satisfy these tiling constraints the pad rows/columns must be
    # masked out of BOTH the negative sum and the nonzero count.
    tm = _pick_tile(M, min(tm, max(M // 2, 8)), 8)    # >=2 row blocks (v7x megacore)
    tn = _pick_tile(M, min(tn, M), 128)
    nblk = M // tm
    ncol = M // tn

    itemsize = jnp.dtype(mxu_dtype).itemsize
    col_resident = (D * M * itemsize) <= 4 * 1024 * 1024   # keep (D, M) in VMEM
    if col_resident:
        col_spec = pl.BlockSpec((D, M), lambda i, j: (0, 0))
    else:
        col_spec = pl.BlockSpec((D, tn), lambda i, j: (0, j))

    # Right-sized VMEM request: double-buffered operands + resident f32 output
    # accumulators + headroom for live (tm, tn) f32 intermediates.
    vmem_est = (2 * tm * D * itemsize
                + 2 * D * (M if col_resident else tn) * itemsize
                + 2 * 2 * tn * 4
                + 6 * tm * tn * 4)
    vmem_limit = max(4 * 1024 * 1024, int(vmem_est * 1.25))

    kernel = functools.partial(_neg_contrastive_kernel,
                               num_pos=N, tm=tm, tn=tn, total_m=M,
                               col_resident=col_resident)

    nsums, ncnts = pl.pallas_call(
        kernel,
        out_shape=(jax.ShapeDtypeStruct((nblk, 1, tn), jnp.float32),
                   jax.ShapeDtypeStruct((nblk, 1, tn), jnp.float32)),
        grid_spec=pltpu.PrefetchScalarGridSpec(
            num_scalar_prefetch=0,
            grid=(nblk, ncol),
            in_specs=[
                pl.BlockSpec((tm, D), lambda i, j: (i, 0)),   # row block (once per i)
                col_spec,                                      # column operand
            ],
            out_specs=[
                pl.BlockSpec((1, 1, tn), lambda i, j: (i, 0, 0)),  # resident over j
                pl.BlockSpec((1, 1, tn), lambda i, j: (i, 0, 0)),
            ],
        ),
        compiler_params=pltpu.CompilerParams(
            dimension_semantics=("parallel", "arbitrary"),
            vmem_limit_bytes=vmem_limit),
    )(feat_rows, feat_cols)

    neg_sum = jnp.sum(nsums)
    neg_cnt = jnp.sum(ncnts)
    neg_avg = jnp.where(neg_cnt > 0.0, neg_sum / jnp.maximum(neg_cnt, 1.0), 0.0)

    # AvgNonZeroReducer per pair type, summed.
    return pos_avg + neg_avg


# ----------------------------------------------------------------------------
# Plain-JAX glue: a simple grid sampler (gathers have no clean BlockSpec form).
# ----------------------------------------------------------------------------
def simple_grid_sampler(desc1, desc2, aflow, stride=2):
    """desc*: (B, C, H, W); aflow: (B, 2, H, W) with aflow[:,0]=x2, aflow[:,1]=y2.
    Returns feat1, feat2: (N, C) matched descriptor pairs."""
    # TODO(synk): the original NghSampler2 also uses `reliability` and sub-pixel
    # interpolation; this simplified sampler uses nearest-neighbor flow lookup.
    B, C, H, W = desc1.shape
    ys = jnp.arange(0, H, stride)
    xs = jnp.arange(0, W, stride)
    yy, xx = jnp.meshgrid(ys, xs, indexing="ij")
    yy = yy.reshape(-1)
    xx = xx.reshape(-1)                                   # (P,)

    feat1 = desc1[:, :, yy, xx]                           # (B, C, P)
    x2 = jnp.clip(jnp.round(aflow[:, 0, yy, xx]), 0, W - 1).astype(jnp.int32)
    y2 = jnp.clip(jnp.round(aflow[:, 1, yy, xx]), 0, H - 1).astype(jnp.int32)
    feat2 = jax.vmap(lambda d, y, x: d[:, y, x])(desc2, y2, x2)   # (B, C, P)

    feat1 = feat1.transpose(0, 2, 1).reshape(-1, C)       # (N, C)
    feat2 = feat2.transpose(0, 2, 1).reshape(-1, C)
    return feat1, feat2


def metric_loss_forward(desc1, desc2, aflow, stride=2):
    feat1, feat2 = simple_grid_sampler(desc1, desc2, aflow, stride)
    # labels = cat([arange(N), arange(N)]) are reproduced analytically: positive
    # pairs are (r, r±N), negatives are everything else off the self-diagonal.
    return contrastive_loss_pallas(feat1.astype(jnp.float32),
                                   feat2.astype(jnp.float32))


if __name__ == "__main__":
    key = jax.random.PRNGKey(0)
    B, C, H, W = 2, 32, 16, 16
    k1, k2, k3 = jax.random.split(key, 3)
    desc1 = jax.random.normal(k1, (B, C, H, W), jnp.float32)
    desc2 = jax.random.normal(k2, (B, C, H, W), jnp.float32)

    # Synthetic absolute flow: identity correspondence + small random offsets.
    gy, gx = jnp.meshgrid(jnp.arange(H, dtype=jnp.float32),
                          jnp.arange(W, dtype=jnp.float32), indexing="ij")
    base = jnp.stack([gx, gy])[None]                          # (1, 2, H, W) -> (x2, y2)
    noise = 2.0 * jax.random.uniform(k3, (B, 2, H, W), jnp.float32) - 1.0
    aflow = jnp.broadcast_to(base, (B, 2, H, W)) + noise

    loss = metric_loss_forward(desc1, desc2, aflow, stride=2)  # N=128, M=256, D=32
    jax.block_until_ready(loss)
    print("KERNEL_OK")
</pallas_src>

<mosaic_0001>
module attributes {stable_mosaic.version = 11 : i64} {
  func.func @_neg_contrastive_kernel(%arg0: i32, %arg1: i32, %arg2: memref<128x32xbf16, #tpu.memory_space<vmem>>, %arg3: memref<32x256xbf16, #tpu.memory_space<vmem>>, %arg4: memref<1x1x256xf32, #tpu.memory_space<vmem>>, %arg5: memref<1x1x256xf32, #tpu.memory_space<vmem>>) attributes {dimension_semantics = [#tpu.dimension_semantics<parallel>, #tpu.dimension_semantics<arbitrary>], iteration_bounds = array<i64: 2, 1>, scalar_prefetch = 0 : i64, scratch_operands = 0 : i64, tpu.core_type = #tpu.core_type<tc>, window_params = [{transform_indices = @transform_0, window_bounds = array<i64: 128, 32>}, {pipeline_mode = #tpu.pipeline_mode<synchronous>, transform_indices = @transform_1, window_bounds = array<i64: 32, 256>}, {transform_indices = @transform_2, window_bounds = array<i64: 1, 1, 256>}, {transform_indices = @transform_3, window_bounds = array<i64: 1, 1, 256>}]} {
    %c0_i32 = arith.constant 0 : i32
    %0 = arith.cmpi eq, %arg1, %c0_i32 : i32
    %1 = arith.extui %0 : i1 to i32
    %c0_i32_0 = arith.constant 0 : i32
    %2 = arith.cmpi ne, %1, %c0_i32_0 : i32
    scf.if %2 {
      %cst_23 = arith.constant 0.000000e+00 : f32
      %50 = vector.broadcast %cst_23 : f32 to vector<1x1x256xf32>
      %c0_24 = arith.constant 0 : index
      %c0_25 = arith.constant 0 : index
      %c0_26 = arith.constant 0 : index
      %51 = vector.load %arg4[%c0_24, %c0_25, %c0_26] : memref<1x1x256xf32, #tpu.memory_space<vmem>>, vector<1x1x256xf32>
      tpu.vector_store %arg4[%c0_24, %c0_25, %c0_26], %50 {strides = array<i32>} : memref<1x1x256xf32, #tpu.memory_space<vmem>>, vector<1x1x256xf32>,
      %cst_27 = arith.constant 0.000000e+00 : f32
      %52 = vector.broadcast %cst_27 : f32 to vector<1x1x256xf32>
      %c0_28 = arith.constant 0 : index
      %c0_29 = arith.constant 0 : index
      %c0_30 = arith.constant 0 : index
      %53 = vector.load %arg5[%c0_28, %c0_29, %c0_30] : memref<1x1x256xf32, #tpu.memory_space<vmem>>, vector<1x1x256xf32>
      tpu.vector_store %arg5[%c0_28, %c0_29, %c0_30], %52 {strides = array<i32>} : memref<1x1x256xf32, #tpu.memory_space<vmem>>, vector<1x1x256xf32>,
    } else {
    }
    %c0 = arith.constant 0 : index
    %c0_1 = arith.constant 0 : index
    %3 = vector.load %arg3[%c0, %c0_1] : memref<32x256xbf16, #tpu.memory_space<vmem>>, vector<32x256xbf16>
    %c0_2 = arith.constant 0 : index
    %c0_3 = arith.constant 0 : index
    %4 = vector.load %arg2[%c0_2, %c0_3] : memref<128x32xbf16, #tpu.memory_space<vmem>>, vector<128x32xbf16>
    %cst = arith.constant dense<0.000000e+00> : vector<128x256xf32>
    %5 = tpu.matmul %4, %3, %cst {dimension_numbers = #tpu.dot_dimension_numbers<[1], [0], [0], [1], [0, 0, 1, 1], [], []>} : vector<128x32xbf16>, vector<32x256xbf16>, vector<128x256xf32> -> vector<128x256xf32>
    %cst_4 = arith.constant 2.000000e+00 : f32
    %6 = vector.broadcast %cst_4 : f32 to vector<128x256xf32>
    %7 = arith.mulf %6, %5 : vector<128x256xf32>
    %cst_5 = arith.constant 2.000000e+00 : f32
    %8 = vector.broadcast %cst_5 : f32 to vector<128x256xf32>
    %9 = arith.subf %8, %7 : vector<128x256xf32>
    %cst_6 = arith.constant 0.000000e+00 : f32
    %10 = vector.broadcast %cst_6 : f32 to vector<128x256xf32>
    %11 = arith.maximumf %9, %10 : vector<128x256xf32>
    %cst_7 = arith.constant 9.99999996E-13 : f32
    %12 = vector.broadcast %cst_7 : f32 to vector<128x256xf32>
    %13 = arith.addf %11, %12 : vector<128x256xf32>
    %14 = math.rsqrt %13 : vector<128x256xf32>
    %15 = arith.mulf %11, %14 : vector<128x256xf32>
    %cst_8 = arith.constant 1.000000e+00 : f32
    %16 = vector.broadcast %cst_8 : f32 to vector<128x256xf32>
    %17 = arith.subf %16, %15 : vector<128x256xf32>
    %cst_9 = arith.constant 0.000000e+00 : f32
    %18 = vector.broadcast %cst_9 : f32 to vector<128x256xf32>
    %19 = arith.maximumf %17, %18 : vector<128x256xf32>
    %cst_10 = arith.constant 5.000000e-01 : f32
    %20 = vector.broadcast %cst_10 : f32 to vector<128x256xf32>
    %21 = arith.cmpf ogt, %5, %20 : vector<128x256xf32>
    %22 = arith.extui %21 : vector<128x256xi1> to vector<128x256xi32>
    %23 = arith.sitofp %22 : vector<128x256xi32> to vector<128x256xf32>
    %c128_i32 = arith.constant 128 : i32
    %24 = arith.muli %arg0, %c128_i32 : i32
    %c256_i32 = arith.constant 256 : i32
    %25 = arith.muli %arg1, %c256_i32 : i32
    %c256_i32_11 = arith.constant 256 : i32
    %26 = arith.addi %25, %c256_i32_11 : i32
    %c1_i32 = arith.constant 1 : i32
    %27 = arith.subi %26, %c1_i32 : i32
    %28 = arith.subi %24, %27 : i32
    %c128_i32_12 = arith.constant 128 : i32
    %29 = arith.muli %arg0, %c128_i32_12 : i32
    %c128_i32_13 = arith.constant 128 : i32
    %30 = arith.addi %29, %c128_i32_13 : i32
    %c1_i32_14 = arith.constant 1 : i32
    %31 = arith.subi %30, %c1_i32_14 : i32
    %c256_i32_15 = arith.constant 256 : i32
    %32 = arith.muli %arg1, %c256_i32_15 : i32
    %33 = arith.subi %31, %32 : i32
    %c0_i32_16 = arith.constant 0 : i32
    %34 = arith.cmpi sle, %28, %c0_i32_16 : i32
    %c0_i32_17 = arith.constant 0 : i32
    %35 = arith.cmpi sge, %33, %c0_i32_17 : i32
    %36 = arith.andi %34, %35 : i1
    %c128_i32_18 = arith.constant 128 : i32
    %37 = arith.cmpi sle, %28, %c128_i32_18 : i32
    %c128_i32_19 = arith.constant 128 : i32
    %38 = arith.cmpi sge, %33, %c128_i32_19 : i32
    %39 = arith.andi %37, %38 : i1
    %c-128_i32 = arith.constant -128 : i32
    %40 = arith.cmpi sle, %28, %c-128_i32 : i32
    %c-128_i32_20 = arith.constant -128 : i32
    %41 = arith.cmpi sge, %33, %c-128_i32_20 : i32
    %42 = arith.andi %40, %41 : i1
    %43 = arith.ori %39, %42 : i1
    %44 = arith.ori %36, %43 : i1
    %45 = arith.extui %44 : i1 to i32
    %c0_i32_21 = arith.constant 0 : i32
    %46 = arith.cmpi ne, %45, %c0_i32_21 : i32
    scf.if %46 {
      %50 = tpu.iota {dimensions = array<i32: 0>} : vector<128x256xi32>
      %51 = tpu.iota {dimensions = array<i32: 1>} : vector<128x256xi32>
      %52 = arith.subi %50, %51 : vector<128x256xi32>
      %c128_i32_23 = arith.constant 128 : i32
      %53 = arith.muli %arg0, %c128_i32_23 : i32
      %c256_i32_24 = arith.constant 256 : i32
      %54 = arith.muli %arg1, %c256_i32_24 : i32
      %55 = arith.subi %53, %54 : i32
      %56 = vector.broadcast %55 : i32 to vector<128x256xi32>
      %57 = arith.addi %52, %56 : vector<128x256xi32>
      %c0_i32_25 = arith.constant 0 : i32
      %58 = vector.broadcast %c0_i32_25 : i32 to vector<128x256xi32>
      %59 = arith.cmpi eq, %57, %58 : vector<128x256xi32>
      %60 = math.absi %57 : vector<128x256xi32>
      %c128_i32_26 = arith.constant 128 : i32
      %61 = vector.broadcast %c128_i32_26 : i32 to vector<128x256xi32>
      %62 = arith.cmpi eq, %60, %61 : vector<128x256xi32>
      %63 = arith.ori %59, %62 : vector<128x256xi1>
      %cst_27 = arith.constant dense<true> : vector<128x256xi1>
      %64 = arith.xori %63, %cst_27 : vector<128x256xi1>
      %65 = arith.extui %64 : vector<128x256xi1> to vector<128x256xi32>
      %66 = arith.sitofp %65 : vector<128x256xi32> to vector<128x256xf32>
      %67 = arith.mulf %19, %66 : vector<128x256xf32>
      %68 = arith.mulf %23, %66 : vector<128x256xf32>
      %c0_28 = arith.constant 0 : index
      %c0_29 = arith.constant 0 : index
      %c0_30 = arith.constant 0 : index
      %69 = vector.load %arg4[%c0_28, %c0_29, %c0_30] : memref<1x1x256xf32, #tpu.memory_space<vmem>>, vector<1x1x256xf32>
      %cst_31 = arith.constant dense<0.000000e+00> : vector<256xf32>
      %70 = vector.multi_reduction <add>, %67, %cst_31 [0] : vector<128x256xf32> to vector<256xf32>
      %71 = vector.shape_cast %70 : vector<256xf32> to vector<1x256xf32>
      %72 = vector.shape_cast %71 : vector<1x256xf32> to vector<1x1x256xf32>
      %73 = arith.addf %69, %72 : vector<1x1x256xf32>
      %c0_32 = arith.constant 0 : index
      %c0_33 = arith.constant 0 : index
      %c0_34 = arith.constant 0 : index
      %74 = vector.load %arg4[%c0_32, %c0_33, %c0_34] : memref<1x1x256xf32, #tpu.memory_space<vmem>>, vector<1x1x256xf32>
      tpu.vector_store %arg4[%c0_32, %c0_33, %c0_34], %73 {strides = array<i32>} : memref<1x1x256xf32, #tpu.memory_space<vmem>>, vector<1x1x256xf32>,
      %c0_35 = arith.constant 0 : index
      %c0_36 = arith.constant 0 : index
      %c0_37 = arith.constant 0 : index
      %75 = vector.load %arg5[%c0_35, %c0_36, %c0_37] : memref<1x1x256xf32, #tpu.memory_space<vmem>>, vector<1x1x256xf32>
      %cst_38 = arith.constant dense<0.000000e+00> : vector<256xf32>
      %76 = vector.multi_reduction <add>, %68, %cst_38 [0] : vector<128x256xf32> to vector<256xf32>
      %77 = vector.shape_cast %76 : vector<256xf32> to vector<1x256xf32>
      %78 = vector.shape_cast %77 : vector<1x256xf32> to vector<1x1x256xf32>
      %79 = arith.addf %75, %78 : vector<1x1x256xf32>
      %c0_39 = arith.constant 0 : index
      %c0_40 = arith.constant 0 : index
      %c0_41 = arith.constant 0 : index
      %80 = vector.load %arg5[%c0_39, %c0_40, %c0_41] : memref<1x1x256xf32, #tpu.memory_space<vmem>>, vector<1x1x256xf32>
      tpu.vector_store %arg5[%c0_39, %c0_40, %c0_41], %79 {strides = array<i32>} : memref<1x1x256xf32, #tpu.memory_space<vmem>>, vector<1x1x256xf32>,
    } else {
    }
    %true = arith.constant true
    %47 = arith.xori %44, %true : i1
    %48 = arith.extui %47 : i1 to i32
    %c0_i32_22 = arith.constant 0 : i32
    %49 = arith.cmpi ne, %48, %c0_i32_22 : i32
    scf.if %49 {
      %c0_23 = arith.constant 0 : index
      %c0_24 = arith.constant 0 : index
      %c0_25 = arith.constant 0 : index
      %50 = vector.load %arg4[%c0_23, %c0_24, %c0_25] : memref<1x1x256xf32, #tpu.memory_space<vmem>>, vector<1x1x256xf32>
      %cst_26 = arith.constant dense<0.000000e+00> : vector<256xf32>
      %51 = vector.multi_reduction <add>, %19, %cst_26 [0] : vector<128x256xf32> to vector<256xf32>
      %52 = vector.shape_cast %51 : vector<256xf32> to vector<1x256xf32>
      %53 = vector.shape_cast %52 : vector<1x256xf32> to vector<1x1x256xf32>
      %54 = arith.addf %50, %53 : vector<1x1x256xf32>
      %c0_27 = arith.constant 0 : index
      %c0_28 = arith.constant 0 : index
      %c0_29 = arith.constant 0 : index
      %55 = vector.load %arg4[%c0_27, %c0_28, %c0_29] : memref<1x1x256xf32, #tpu.memory_space<vmem>>, vector<1x1x256xf32>
      tpu.vector_store %arg4[%c0_27, %c0_28, %c0_29], %54 {strides = array<i32>} : memref<1x1x256xf32, #tpu.memory_space<vmem>>, vector<1x1x256xf32>,
      %c0_30 = arith.constant 0 : index
      %c0_31 = arith.constant 0 : index
      %c0_32 = arith.constant 0 : index
      %56 = vector.load %arg5[%c0_30, %c0_31, %c0_32] : memref<1x1x256xf32, #tpu.memory_space<vmem>>, vector<1x1x256xf32>
      %cst_33 = arith.constant dense<0.000000e+00> : vector<256xf32>
      %57 = vector.multi_reduction <add>, %23, %cst_33 [0] : vector<128x256xf32> to vector<256xf32>
      %58 = vector.shape_cast %57 : vector<256xf32> to vector<1x256xf32>
      %59 = vector.shape_cast %58 : vector<1x256xf32> to vector<1x1x256xf32>
      %60 = arith.addf %56, %59 : vector<1x1x256xf32>
      %c0_34 = arith.constant 0 : index
      %c0_35 = arith.constant 0 : index
      %c0_36 = arith.constant 0 : index
      %61 = vector.load %arg5[%c0_34, %c0_35, %c0_36] : memref<1x1x256xf32, #tpu.memory_space<vmem>>, vector<1x1x256xf32>
      tpu.vector_store %arg5[%c0_34, %c0_35, %c0_36], %60 {strides = array<i32>} : memref<1x1x256xf32, #tpu.memory_space<vmem>>, vector<1x1x256xf32>,
    } else {
    }
    return
  }
  func.func @transform_0(%arg0: i32, %arg1: i32) -> (i32, i32) {
    %c0_i32 = arith.constant 0 : i32
    %c0_i32_0 = arith.constant 0 : i32
    return %arg0, %c0_i32 : i32, i32
  }
  func.func @transform_1(%arg0: i32, %arg1: i32) -> (i32, i32) {
    %c0_i32 = arith.constant 0 : i32
    %c0_i32_0 = arith.constant 0 : i32
    %c0_i32_1 = arith.constant 0 : i32
    return %c0_i32, %c0_i32_0 : i32, i32
  }
  func.func @transform_2(%arg0: i32, %arg1: i32) -> (i32, i32, i32) {
    %c0_i32 = arith.constant 0 : i32
    %c0_i32_0 = arith.constant 0 : i32
    %c0_i32_1 = arith.constant 0 : i32
    return %arg0, %c0_i32, %c0_i32_0 : i32, i32, i32
  }
  func.func @transform_3(%arg0: i32, %arg1: i32) -> (i32, i32, i32) {
    %c0_i32 = arith.constant 0 : i32
    %c0_i32_0 = arith.constant 0 : i32
    %c0_i32_1 = arith.constant 0 : i32
    return %arg0, %c0_i32, %c0_i32_0 : i32, i32, i32
  }
}

</mosaic_0001>

<bundles_post_ra>
// kernel: tpu_custom_call.1
= control target key start
LH: loop header
LB: loop body
LE: loop exit
PB: predicated region body
PF: predicated region fallthrough
CT: control target
= control target key end

     0   :  { %9 = vsyncpa [#allocation3], 0  ;;  %s3560_s0 = inlined_call_operand.vmem [shape: bf16[256,32], index: 0, kind: input, shape index: {}]   ;;  %s3561_s1 = inlined_call_operand.vmem [shape: bf16[32,256], index: 1, kind: input, shape index: {}]   ;;  %s3562_s2 = inlined_call_operand.hbm [shape: f32[2,1,256], index: 2, kind: output, shape index: {0}]   ;;  %s3563_s3 = inlined_call_operand.hbm [shape: f32[2,1,256], index: 3, kind: output, shape index: {1}]  }
   0x1   :  { %11 = vsyncpa [#allocation3 + $0x1], 0 }
   0x2   :  { %12 = vsyncpa [#allocation5], 0 }
   0x3   :  { %14 = vsyncpa [#allocation5 + $0x1], 0  ;;  %s2057_s12 = smov 0   ;;  %s2059_s13 = smov 0  }
   0x4   :  { %s2061_s14 = smov 0   ;;  %s2063_s15 = smov 0  }
   0x5   :  { %s2065_s16 = smov 0   ;;  %s2067_s17 = smov 0  }
   0x6 LB: > { %s1632_s18 = sadd.s32 4294967295, %s2027_s17   ;;  %s1633_s19 = sadd.s32 4294967294, %s2027_s17   ;;  %s2027_s17 = sphi %s2067_s17, %s20_s17   ;;  %s2023_s16 = sphi %s2065_s16, %s3889_s16   ;;  %s2019_s15 = sphi %s2063_s15, %s3888_s15   ;;  %s2015_s14 = sphi %s2061_s14, %s3887_s14   ;;  %s2011_s13 = sphi %s2059_s13, %s3886_s13   ;;  %s2007_s12 = sphi %s2057_s12, %s3885_s12  }
   0x7   : > { %s32_s20 = sadd.s32 1, %s2023_s16  ;;  %s86_s21 = sadd.s32 1, %s2015_s14 }
   0x8   : > { %p34_p0 = scmp.ge.s32.totalorder %s32_s20, 2  ;;  %p96_p1 = scmp.ne.s32.totalorder %s2015_s14, %s2011_s13 }
   0x9   : > { %p97_p2 = scmp.eq.s32.totalorder %s1632_s18, 1  ;;  %p102_p3 = scmp.ne.s32.totalorder %s2011_s13, %s2007_s12 }
   0xa   : > { %s3891_s20 = smov (%p34_p0, %s32_s20), 0  ;;  %p103_p5 = scmp.eq.s32.totalorder %s1633_s19, 1 }
   0xb   : > { %p2097_p4 = por %p97_p2, %p96_p1  ;;  %s83_s23 = ssub.s32 %s2023_s16, %s3891_s20 }
   0xc   : > { %p1636_p6 = scmp.ge.s32.totalorder %s2027_s17, 1  ;;  %p84_p7 = scmp.eq.s32.totalorder %s83_s23, 0 }
   0xd   : > { %s3577_s22 = scalar_select %p2097_p4, 1, 0 }
   0xe   : > { %p2104_p8 = por %p103_p5, %p102_p3  ;;  %p159_p9 = scmp.lt.s32.totalorder %s2027_s17, 3 }
   0xf   : > { %s2110_s25 = scalar_select %p84_p7, %s2015_s14, %s86_s21  }
  0x10   : > { %s3578_s24 = scalar_select %p2104_p8, 1, 0 }
  0x11   : > { %p160_p10 = pnand %p1636_p6, %p159_p9 }
  0x13   : > { %163 = sbr.rel (%p160_p10) target bundleno = 598 (0x256), region = 28 }
  0x1a   : > { %s2113_s26 = sand.u32 1, %s2011_s13   ;;  %v3565_v0 = vlaneseq  ;;  %v1839_v1 = vld [vmem:[%s3561_s1 + $0x4] ss:$8 sps:$4 sm:$0xff]   ;;  %v1841_v2 = vld [vmem:[%s3561_s1] ss:$8 sps:$4 sm:$0xff]   ;;  %v2029_v3 = vmov 0  }
  0x1b   : > { %s1637_s29 = sshll.u32 %s2113_s26, 1  ;;  %342 = vmatprep.mubr.bf16.mxu0 %v2029_v3  ;;  %382 = vmatprep.mubr.bf16.mxu1 %v2029_v3  ;;  %s1639_s5 = sshll.u32 %s2019_s15, 4  ;;  %v3579_v4 = vmov 0  ;;  %v1842_v5 = vld [vmem:[%s3561_s1 + $0x14] ss:$8 sps:$4 sm:$0xff]   ;;  %v3567_v7 = vmov 0.0  }
  0x1c   : > { %vm2124_vm0 = vcmp.lt.s32.totalorder %v3565_v0, 256  ;;  %310 = vmatprep.subr.bf16.mxu0 %v1839_v1  ;;  %1769 = vmatprep.subr.bf16.mxu1 %v1839_v1  ;;  %v1844_v6 = vld [vmem:[%s3561_s1 + $0x10] ss:$8 sps:$4 sm:$0xff]   ;;  %p189_p11 = scmp.lt.s32.totalorder %s1639_s5, 31  ;;  %s2134_s10 = scalar_lea.vmem [#allocation2], %s1637_s29  ;;  %vm285_vm1 = vcmask 261120  }
  0x1d   : > { %v3580_v4 = vsel %vm2124_vm0, 4294967295, %v3579_v4  ;;  %311 = vmatpush1.bf16.msra.mxu0 %v1841_v2  ;;  %1771 = vmatpush1.bf16.msra.mxu1 %v1841_v2  ;;  %203 = vst.msk [vmem:[%s2134_s10] sm:$0x3] %vm2124_vm0, %v3567_v7  ;;  %s2140_s11 = scalar_lea.vmem [#allocation4], %s1637_s29  ;;  %s2158_s27 = sshll.u32 %s2019_s15, 7 }
  0x1e   : > { %3581 = vst [vmem:[#allocation8_spill] sm:$0xff] %v3580_v4  ;;  %312 = vmatprep.subr.bf16.mxu0 %v1842_v5  ;;  %1770 = vmatprep.subr.bf16.mxu1 %v1842_v5  ;;  %204 = vst.msk [vmem:[%s2140_s11] sm:$0x3] %vm2124_vm0, %v3567_v7  ;;  %s3893_s5 = smov (!%p189_p11, %s1639_s5), 31  ;;  %s1694_s28 = sadd.s32 4294967041, %s2158_s27 }
  0x1f   : > { %s1640_s18 = sshll.u32 %s3893_s5, 2  ;;  %s779_s29 = sadd.s32 127, %s2158_s27 }
  0x20   : > { %s192_s23 = scalar_lea.vmem %s3560_s0, %s1640_s18  ;;  %p785_p12 = scmp.le.s32.totalorder %s1694_s28, 128 }
  0x21   : > { %313 = vmatpush1.bf16.msra.mxu0 %v1844_v6  ;;  %1772 = vmatpush1.bf16.msra.mxu1 %v1844_v6  ;;  %v1845_v8 = vld [vmem:[%s192_s23] sm:$0xff]   ;;  %v1847_v10 = vld [vmem:[%s192_s23 + $0x8] sm:$0xff]   ;;  %v1849_v12 = vld [vmem:[%s192_s23 + $0x10] sm:$0xff]   ;;  %p786_p13 = scmp.ge.s32.totalorder %s779_s29, 128  ;;  %p789_p0 = scmp.le.s32.totalorder %s1694_s28, 4294967168 }
  0x22   : > { %v1846_v9 = vld [vmem:[%s192_s23 + $0x20] sm:$0xff]   ;;  %v1848_v11 = vld [vmem:[%s192_s23 + $0x28] sm:$0xff]   ;;  %v1850_v13 = vld [vmem:[%s192_s23 + $0x30] sm:$0xff]   ;;  %p790_p1 = scmp.ge.s32.totalorder %s779_s29, 4294967168  ;;  %p781_p2 = scmp.le.s32.totalorder %s1694_s28, 0 }
  0x23   : > { %v1851_v14 = vld [vmem:[%s192_s23 + $0x18] sm:$0xff]   ;;  %p782_p3 = scmp.ge.s32.totalorder %s779_s29, 0  ;;  %p787_p5 = pnand %p786_p13, %p785_p12 }
  0x24   : > { %1653 = vmatmul.mubr.msk.bf16.vlgmr.msra.gmra.mrb[0].mxu0 %vm285_vm1, %v1845_v8  ;;  %1657 = vmatmul.mubr.msk.bf16.vlgmr.msra.gmra.mrb[0].mxu1 %vm285_vm1, %v1846_v9  ;;  %v1852_v15 = vld [vmem:[%s192_s23 + $0x38] sm:$0xff]   ;;  %p791_p6 = pnand %p790_p1, %p789_p0 }
  0x25   : > { %352 = vmatprep.mubr.bf16.mxu0 %v2029_v3  ;;  %392 = vmatprep.mubr.bf16.mxu1 %v2029_v3  ;;  %p783_p7 = pnand %p782_p3, %p781_p2  ;;  %p788_p9 = pneg %p787_p5 }
  0x26   : > { %p792_p10 = pneg %p791_p6 }
  0x27   : > { %p784_p11 = pneg %p783_p7 }
  0x28   : > { %p793_p8 = por %p792_p10, %p788_p9 }
  0x2a   : > { %p2162_p4 = por %p793_p8, %p784_p11 }
  0x2c   : > { %1654 = vmatmul.mubr.msk.bf16.gmra.mrb[4].mxu0 %vm285_vm1, %v1847_v10  ;;  %1658 = vmatmul.mubr.msk.bf16.gmra.mrb[4].mxu1 %vm285_vm1, %v1848_v11 }
  0x2d   : > { %362 = vmatprep.mubr.bf16.mxu0 %v2029_v3  ;;  %402 = vmatprep.mubr.bf16.mxu1 %v2029_v3 }
  0x34   : > { %1655 = vmatmul.mubr.msk.bf16.gmra.mrb[8].mxu0 %vm285_vm1, %v1849_v12  ;;  %1659 = vmatmul.mubr.msk.bf16.gmra.mrb[8].mxu1 %vm285_vm1, %v1850_v13 }
  0x35   : > { %372 = vmatprep.mubr.bf16.mxu0 %v2029_v3  ;;  %412 = vmatprep.mubr.bf16.mxu1 %v2029_v3 }
  0x3c   : > { %1656 = vmatmul.mubr.msk.bf16.gmra.mrb[12].mxu0 %vm285_vm1, %v1851_v14  ;;  %1660 = vmatmul.mubr.msk.bf16.gmra.mrb[12].mxu1 %vm285_vm1, %v1852_v15 }
  0xf7   : > { %v344_v16 = vpop.f32.mrb[0].mxu0  ;;  %v384_v18 = vpop.f32.mrb[0].mxu1 }
  0xf8   : > { %v423_v17 = vmul.f32 2.0, %v344_v16  ;;  %vm679_vm2 = vcmp.gt.f32.partialorder %v344_v16, 0.5  ;;  %v346_v19 = vpop.f32.mrb[1].mxu0  ;;  %v439_v21 = vmul.f32 2.0, %v384_v18  ;;  %vm695_vm3 = vcmp.gt.f32.partialorder %v384_v18, 0.5  ;;  %v386_v23 = vpop.f32.mrb[1].mxu1 }
  0xf9   : > { %v2167_v20 = vsel %vm679_vm2, 1.0, %v3567_v7  ;;  %v424_v22 = vmul.f32 2.0, %v346_v19  ;;  %v348_v24 = vpop.f32.mrb[2].mxu0  ;;  %v2170_v26 = vsel %vm695_vm3, 1.0, %v3567_v7  ;;  %vm680_vm4 = vcmp.gt.f32.partialorder %v346_v19, 0.5  ;;  %v388_v28 = vpop.f32.mrb[2].mxu1 }
  0xfa   : > { %3583 = vst [vmem:[#allocation9_spill] sm:$0xff] %v2167_v20  ;;  %v455_v25 = vsub.f32 2.0, %v423_v17  ;;  %3584 = vst [vmem:[#allocation10_spill] sm:$0xff] %v2170_v26  ;;  %v440_v27 = vmul.f32 2.0, %v386_v23  ;;  %v350_v29 = vpop.f32.mrb[3].mxu0  ;;  %v471_v30 = vsub.f32 2.0, %v439_v21 }
  0xfb   : > { %v456_v31 = vsub.f32 2.0, %v424_v22  ;;  %v2173_v32 = vsel %vm680_vm4, 1.0, %v3567_v7  ;;  %vm696_vm5 = vcmp.gt.f32.partialorder %v386_v23, 0.5  ;;  %v390_v33 = vpop.f32.mrb[3].mxu1  ;;  %v425_v37 = vmul.f32 2.0, %v348_v24 }
  0xfc   : > { %3585 = vst [vmem:[#allocation11_spill] sm:$0xff] %v2173_v32  ;;  %v2175_v34 = vmax.f32 %v455_v25, 0.0  ;;  %v472_v35 = vsub.f32 2.0, %v440_v27  ;;  %v2178_v36 = vsel %vm696_vm5, 1.0, %v3567_v7  ;;  %v2180_v38 = vmax.f32 %v471_v30, 0.0 }
  0xfd   : > { %3586 = vst [vmem:[#allocation12_spill] sm:$0xff] %v2178_v36  ;;  %v2182_v39 = vmax.f32 %v456_v31, 0.0  ;;  %vm681_vm6 = vcmp.gt.f32.partialorder %v348_v24, 0.5  ;;  %v441_v40 = vmul.f32 2.0, %v388_v28  ;;  %v457_v43 = vsub.f32 2.0, %v425_v37 }
  0xfe   : > { %v519_v41 = vadd.f32 1e-12, %v2175_v34  ;;  %v2185_v42 = vmax.f32 %v472_v35, 0.0  ;;  %v2188_v44 = vsel %vm681_vm6, 1.0, %v3567_v7  ;;  %v535_v45 = vadd.f32 1e-12, %v2180_v38 }
  0xff   : > { %3587 = vst [vmem:[#allocation13_spill] sm:$0xff] %v2188_v44  ;;  %v520_v46 = vadd.f32 1e-12, %v2182_v39  ;;  %v473_v47 = vsub.f32 2.0, %v441_v40  ;;  %vm697_vm7 = vcmp.gt.f32.partialorder %v388_v28, 0.5  ;;  %v2193_v49 = vmax.f32 %v457_v43, 0.0 }
 0x100   : > { %1853 = vrsqrt.f32 %v519_v41  ;;  %v536_v48 = vadd.f32 1e-12, %v2185_v42  ;;  %v2196_v50 = vsel %vm697_vm7, 1.0, %v3567_v7  ;;  %v354_v51 = vpop.f32.mrb[4].mxu0  ;;  %v394_v52 = vpop.f32.mrb[4].mxu1  ;;  %v426_v54 = vmul.f32 2.0, %v350_v29 }
 0x101   : > { %3588 = vst [vmem:[#allocation14_spill] sm:$0xff] %v2196_v50  ;;  %1855 = vrsqrt.f32 %v535_v45  ;;  %v2198_v53 = vmax.f32 %v473_v47, 0.0  ;;  %vm682_vm8 = vcmp.gt.f32.partialorder %v350_v29, 0.5  ;;  %v356_v55 = vpop.f32.mrb[5].mxu0  ;;  %v396_v56 = vpop.f32.mrb[5].mxu1  ;;  %v442_v59 = vmul.f32 2.0, %v390_v33 }
 0x102   : > { %1857 = vrsqrt.f32 %v520_v46  ;;  %v521_v57 = vadd.f32 1e-12, %v2193_v49  ;;  %v2202_v58 = vsel %vm682_vm8, 1.0, %v3567_v7  ;;  %v2204_v60 = vpop.f32.mrb[6].mxu0  ;;  %v2206_v61 = vpop.f32.mrb[6].mxu1  ;;  %v458_v63 = vsub.f32 2.0, %v426_v54 }
 0x103   : > { %3589 = vst [vmem:[#allocation15_spill] sm:$0xff] %v2202_v58  ;;  %1859 = vrsqrt.f32 %v536_v48  ;;  %v537_v62 = vadd.f32 1e-12, %v2198_v53  ;;  %vm698_vm9 = vcmp.gt.f32.partialorder %v390_v33, 0.5  ;;  %v2209_v1 = vpop.f32.mrb[7].mxu0  ;;  %v2211_v2 = vpop.f32.mrb[7].mxu1 }
 0x104   : > { %1861 = vrsqrt.f32 %v521_v57  ;;  %v474_v3 = vsub.f32 2.0, %v442_v59  ;;  %v2214_v5 = vsel %vm698_vm9, 1.0, %v3567_v7  ;;  %v427_v6 = vmul.f32 2.0, %v354_v51 }
 0x105   : > { %3590 = vst [vmem:[#allocation16_spill] sm:$0xff] %v2214_v5  ;;  %1863 = vrsqrt.f32 %v537_v62  ;;  %v2216_v8 = vmax.f32 %v458_v63, 0.0  ;;  %vm683_vm10 = vcmp.gt.f32.partialorder %v354_v51, 0.5  ;;  %v443_v9 = vmul.f32 2.0, %v394_v52 }
 0x106   : > { %v2218_v10 = vmax.f32 %v474_v3, 0.0  ;;  %v459_v11 = vsub.f32 2.0, %v427_v6  ;;  %v2221_v12 = vsel %vm683_vm10, 1.0, %v3567_v7  ;;  %vm699_vm11 = vcmp.gt.f32.partialorder %v394_v52, 0.5 }
 0x107   : > { %3591 = vst [vmem:[#allocation17_spill] sm:$0xff] %v2221_v12  ;;  %v522_v13 = vadd.f32 1e-12, %v2216_v8  ;;  %v475_v14 = vsub.f32 2.0, %v443_v9  ;;  %v2225_v15 = vsel %vm699_vm11, 1.0, %v3567_v7  ;;  %v428_v16 = vmul.f32 2.0, %v356_v55 }
 0x108   : > { %3592 = vst [vmem:[#allocation18_spill] sm:$0xff] %v2225_v15  ;;  %v2227_v17 = vpop.f32.mrb[8].mxu0  ;;  %v538_v18 = vadd.f32 1e-12, %v2218_v10  ;;  %v2230_v19 = vmax.f32 %v459_v11, 0.0  ;;  %vm684_vm12 = vcmp.gt.f32.partialorder %v356_v55, 0.5 }
 0x109   : > { %v444_v21 = vmul.f32 2.0, %v396_v56  ;;  %v2232_v22 = vpop.f32.mrb[8].mxu1  ;;  %1865 = vrsqrt.f32 %v522_v13  ;;  %v2234_v23 = vmax.f32 %v475_v14, 0.0  ;;  %v460_v24 = vsub.f32 2.0, %v428_v16  ;;  %v2239_v27 = vpop.f32.mrb[9].mxu0 }
 0x10a   : > { %v2237_v25 = vsel %vm684_vm12, 1.0, %v3567_v7  ;;  %v2241_v28 = vpop.f32.mrb[9].mxu1  ;;  %v1854_v29 = vpop.eup %1853  ;;  %1867 = vrsqrt.f32 %v538_v18  ;;  %v523_v30 = vadd.f32 1e-12, %v2230_v19  ;;  %vm700_vm13 = vcmp.gt.f32.partialorder %v396_v56, 0.5 }
 0x10b   : > { %3593 = vst [vmem:[#allocation19_spill] sm:$0xff] %v2237_v25  ;;  %v476_v31 = vsub.f32 2.0, %v444_v21  ;;  %v2244_v33 = vpop.f32.mrb[10].mxu0  ;;  %v2246_v35 = vpop.f32.mrb[10].mxu1  ;;  %v583_v40 = vmul.f32 %v1854_v29, %v2175_v34  ;;  %v539_v41 = vadd.f32 1e-12, %v2234_v23 }
 0x10c   : > { %v1856_v37 = vpop.eup %1855  ;;  %v2250_v43 = vmax.f32 %v460_v24, 0.0  ;;  %v2253_v45 = vsel %vm700_vm13, 1.0, %v3567_v7  ;;  %v2255_v46 = vpop.f32.mrb[11].mxu0  ;;  %1869 = vrsqrt.f32 %v523_v30  ;;  %v429_v54 = vmul.f32 2.0, %v2204_v60 }
 0x10d   : > { %3594 = vst [vmem:[#allocation20_spill] sm:$0xff] %v2253_v45  ;;  %v2257_v47 = vpop.f32.mrb[11].mxu1  ;;  %v1858_v48 = vpop.eup %1857  ;;  %v599_v51 = vmul.f32 %v1856_v37, %v2180_v38  ;;  %v2260_v52 = vmax.f32 %v476_v31, 0.0  ;;  %v615_v55 = vsub.f32 1.0, %v583_v40  ;;  %1871 = vrsqrt.f32 %v539_v41 }
 0x10e   : > { %v1860_v34 = vpop.eup %1859  ;;  %v584_v56 = vmul.f32 %v1858_v48, %v2182_v39  ;;  %v524_v57 = vadd.f32 1e-12, %v2250_v43  ;;  %v461_v6 = vsub.f32 2.0, %v429_v54  ;;  %vm685_vm14 = vcmp.gt.f32.partialorder %v2204_v60, 0.5 }
 0x10f   : > { %v1862_v59 = vpop.eup %1861  ;;  %v631_v62 = vsub.f32 1.0, %v599_v51  ;;  %v600_v63 = vmul.f32 %v1860_v34, %v2185_v42  ;;  %v540_v3 = vadd.f32 1e-12, %v2260_v52  ;;  %v2267_v9 = vmax.f32 %v615_v55, 0.0  ;;  %v2270_v14 = vpop.f32.mrb[12].mxu0 }
 0x110   : > { %v1864_v38 = vpop.eup %1863  ;;  %v616_v11 = vsub.f32 1.0, %v584_v56  ;;  %v585_v13 = vmul.f32 %v1862_v59, %v2193_v49  ;;  %1873 = vrsqrt.f32 %v524_v57  ;;  %v2275_v21 = vpop.f32.mrb[12].mxu1  ;;  %v2281_v30 = vmax.f32 %v461_v6, 0.0 }
 0x111   : > { %v2272_v39 = vmax.f32 %v631_v62, 0.0  ;;  %v632_v16 = vsub.f32 1.0, %v600_v63  ;;  %v601_v18 = vmul.f32 %v1864_v38, %v2198_v53  ;;  %1875 = vrsqrt.f32 %v540_v3  ;;  %v2277_v42 = vpop.f32.mrb[13].mxu0  ;;  %v2284_v49 = vpop.f32.mrb[13].mxu1 }
 0x112   : > { %v2279_v24 = vmax.f32 %v616_v11, 0.0  ;;  %v617_v29 = vsub.f32 1.0, %v585_v13  ;;  %v2286_v31 = vpop.f32.mrb[14].mxu0  ;;  %v2291_v53 = vsel %vm685_vm14, 1.0, %v3567_v7  ;;  %v445_v41 = vmul.f32 2.0, %v2206_v61  ;;  %v2294_v48 = vpop.f32.mrb[14].mxu1 }
 0x113   : > { %3595 = vst [vmem:[#allocation21_spill] sm:$0xff] %v2272_v39  ;;  %v2288_v37 = vmax.f32 %v632_v16, 0.0  ;;  %v633_v40 = vsub.f32 1.0, %v601_v18  ;;  %3597 = vst [vmem:[#allocation23_spill] sm:$0xff] %v2291_v53  ;;  %v2296_v51 = vpop.f32.mrb[15].mxu0  ;;  %v1866_v54 = vpop.eup %1865  ;;  %vm701_vm15 = vcmp.gt.f32.partialorder %v2206_v61, 0.5 }
 0x114   : > { %v2298_v34 = vmax.f32 %v617_v29, 0.0  ;;  %v525_v60 = vadd.f32 1e-12, %v2281_v30  ;;  %v430_v55 = vmul.f32 2.0, %v2209_v1  ;;  %v2303_v56 = vpop.f32.mrb[15].mxu1  ;;  %v1868_v57 = vpop.eup %1867  ;;  %v586_v62 = vmul.f32 %v1866_v54, %v2216_v8 }
 0x115   : > { %3596 = vst [vmem:[#allocation22_spill] sm:$0xff] %v2288_v37  ;;  %v2305_v59 = vmax.f32 %v633_v40, 0.0  ;;  %v477_v63 = vsub.f32 2.0, %v445_v41  ;;  %v2309_v3 = vsel %vm701_vm15, 1.0, %v3567_v7  ;;  %v602_v6 = vmul.f32 %v1868_v57, %v2218_v10 }
 0x116   : > { %3599 = vst [vmem:[#allocation25_spill] sm:$0xff] %v2309_v3  ;;  %1877 = vrsqrt.f32 %v525_v60  ;;  %v462_v38 = vsub.f32 2.0, %v430_v55  ;;  %vm686_vm1 = vcmp.gt.f32.partialorder %v2209_v1, 0.5  ;;  %v1870_v61 = vpop.eup %1869  ;;  %v618_v11 = vsub.f32 1.0, %v586_v62 }
 0x117   : > { %3598 = vst [vmem:[#allocation24_spill] sm:$0xff] %v2305_v59  ;;  %v2313_v13 = vmax.f32 %v477_v63, 0.0  ;;  %v2316_v16 = vsel %vm686_vm1, 1.0, %v3567_v7  ;;  %v446_v18 = vmul.f32 2.0, %v2211_v2  ;;  %v1872_v8 = vpop.eup %1871  ;;  %v634_v29 = vsub.f32 1.0, %v602_v6 }
 0x118   : > { %3600 = vst [vmem:[#allocation26_spill] sm:$0xff] %v2316_v16  ;;  %v587_v40 = vmul.f32 %v1870_v61, %v2230_v19  ;;  %v2320_v41 = vmax.f32 %v462_v38, 0.0  ;;  %vm702_vm2 = vcmp.gt.f32.partialorder %v2211_v2, 0.5  ;;  %v2323_v10 = vmax.f32 %v618_v11, 0.0 }
 0x119   : > { %v603_v1 = vmul.f32 %v1872_v8, %v2234_v23  ;;  %v541_v54 = vadd.f32 1e-12, %v2313_v13  ;;  %v478_v60 = vsub.f32 2.0, %v446_v18  ;;  %v2327_v57 = vmax.f32 %v634_v29, 0.0 }
 0x11a   : > { %v1874_v55 = vpop.eup %1873  ;;  %v619_v62 = vsub.f32 1.0, %v587_v40  ;;  %v526_v63 = vadd.f32 1e-12, %v2320_v41  ;;  %v2331_v6 = vsel %vm702_vm2, 1.0, %v3567_v7  ;;  %v431_v18 = vmul.f32 2.0, %v2227_v17 }
 0x11b   : > { %3601 = vst [vmem:[#allocation27_spill] sm:$0xff] %v2327_v57  ;;  %3602 = vst [vmem:[#allocation28_spill] sm:$0xff] %v2331_v6  ;;  %v1876_v19 = vpop.eup %1875  ;;  %v635_v38 = vsub.f32 1.0, %v603_v1  ;;  %v588_v2 = vmul.f32 %v1874_v55, %v2250_v43  ;;  %1879 = vrsqrt.f32 %v541_v54  ;;  %v510_v61 = vmax.f32 %v478_v60, 0.0 }
 0x11c   : > { %v2334_v11 = vmax.f32 %v619_v62, 0.0  ;;  %v604_v23 = vmul.f32 %v1876_v19, %v2260_v52  ;;  %1881 = vrsqrt.f32 %v526_v63  ;;  %vm687_vm3 = vcmp.gt.f32.partialorder %v2227_v17, 0.5 }
 0x11d   : > { %v2338_v8 = vmax.f32 %v635_v38, 0.0  ;;  %v620_v29 = vsub.f32 1.0, %v588_v2  ;;  %v542_v40 = vadd.f32 1e-12, %v510_v61  ;;  %v463_v7 = vsub.f32 2.0, %v431_v18 }
 0x11e   : > { %v636_v0 = vsub.f32 1.0, %v604_v23  ;;  %v3604_v1 = vmov 0.0   ;;  %v447_v43 = vmul.f32 2.0, %v2232_v22  ;;  %vm703_vm4 = vcmp.gt.f32.partialorder %v2232_v22, 0.5 }
 0x11f   : > { %3603 = vst [vmem:[#allocation29_spill] sm:$0xff] %v2338_v8  ;;  %v2342_v4 = vsel %vm687_vm3, 1.0, %v3604_v1  ;;  %v2345_v54 = vmax.f32 %v620_v29, 0.0  ;;  %1883 = vrsqrt.f32 %v542_v40  ;;  %v432_v52 = vmul.f32 2.0, %v2239_v27 }
 0x120   : > { %3605 = vst [vmem:[#allocation30_spill] sm:$0xff] %v2342_v4  ;;  %v1878_v60 = vpop.eup %1877  ;;  %v2349_v55 = vmax.f32 %v636_v0, 0.0  ;;  %v2351_v62 = vmax.f32 %v463_v7, 0.0  ;;  %v479_v17 = vsub.f32 2.0, %v447_v43  ;;  %v2354_v63 = vsel %vm703_vm4, 1.0, %v3604_v1 }
 0x121   : > { %3607 = vst [vmem:[#allocation32_spill] sm:$0xff] %v2354_v63  ;;  %v589_v19 = vmul.f32 %v1878_v60, %v2281_v30  ;;  %v464_v38 = vsub.f32 2.0, %v432_v52  ;;  %vm688_vm5 = vcmp.gt.f32.partialorder %v2239_v27, 0.5  ;;  %v448_v2 = vmul.f32 2.0, %v2241_v28 }
 0x122   : > { %3606 = vst [vmem:[#allocation31_spill] sm:$0xff] %v2349_v55  ;;  %v527_v22 = vadd.f32 1e-12, %v2351_v62  ;;  %v2360_v23 = vmax.f32 %v479_v17, 0.0  ;;  %v2363_v0 = vsel %vm688_vm5, 1.0, %v3604_v1  ;;  %vm704_vm6 = vcmp.gt.f32.partialorder %v2241_v28, 0.5 }
 0x123   : > { %3608 = vst [vmem:[#allocation33_spill] sm:$0xff] %v2363_v0  ;;  %v621_v7 = vsub.f32 1.0, %v589_v19  ;;  %v2366_v18 = vmax.f32 %v464_v38, 0.0  ;;  %v480_v29 = vsub.f32 2.0, %v448_v2  ;;  %v2369_v30 = vsel %vm704_vm6, 1.0, %v3604_v1 }
 0x124   : > { %3609 = vst [vmem:[#allocation34_spill] sm:$0xff] %v2369_v30  ;;  %1885 = vrsqrt.f32 %v527_v22  ;;  %v543_v27 = vadd.f32 1e-12, %v2360_v23  ;;  %v433_v40 = vmul.f32 2.0, %v2244_v33  ;;  %vm689_vm7 = vcmp.gt.f32.partialorder %v2244_v33, 0.5 }
 0x125   : > { %v1880_v43 = vpop.eup %1879  ;;  %v2374_v52 = vmax.f32 %v621_v7, 0.0  ;;  %v528_v60 = vadd.f32 1e-12, %v2366_v18  ;;  %v2377_v28 = vmax.f32 %v480_v29, 0.0  ;;  %v2380_v17 = vsel %vm689_vm7, 1.0, %v3604_v1 }
 0x126   : > { %3610 = vst [vmem:[#allocation35_spill] sm:$0xff] %v2380_v17  ;;  %v1882_v19 = vpop.eup %1881  ;;  %v605_v38 = vmul.f32 %v1880_v43, %v2313_v13  ;;  %1887 = vrsqrt.f32 %v543_v27  ;;  %v465_v2 = vsub.f32 2.0, %v433_v40  ;;  %v449_v22 = vmul.f32 2.0, %v2246_v35 }
 0x127   : > { %v590_v30 = vmul.f32 %v1882_v19, %v2320_v41  ;;  %1889 = vrsqrt.f32 %v528_v60  ;;  %v544_v33 = vadd.f32 1e-12, %v2377_v28  ;;  %vm705_vm8 = vcmp.gt.f32.partialorder %v2246_v35, 0.5 }
 0x128   : > { %v637_v7 = vsub.f32 1.0, %v605_v38  ;;  %v2387_v29 = vmax.f32 %v465_v2, 0.0  ;;  %v481_v63 = vsub.f32 2.0, %v449_v22  ;;  %v2390_v6 = vsel %vm705_vm8, 1.0, %v3604_v1 }
 0x129   : > { %3611 = vst [vmem:[#allocation36_spill] sm:$0xff] %v2390_v6  ;;  %v1884_v3 = vpop.eup %1883  ;;  %v622_v13 = vsub.f32 1.0, %v590_v30  ;;  %1891 = vrsqrt.f32 %v544_v33  ;;  %v434_v27 = vmul.f32 2.0, %v2255_v46  ;;  %vm690_vm9 = vcmp.gt.f32.partialorder %v2255_v46, 0.5 }
 0x12a   : > { %v2394_v41 = vmax.f32 %v637_v7, 0.0  ;;  %v606_v40 = vmul.f32 %v1884_v3, %v510_v61  ;;  %v529_v43 = vadd.f32 1e-12, %v2387_v29  ;;  %v2397_v35 = vmax.f32 %v481_v63, 0.0 }
 0x12b   : > { %v2399_v60 = vmax.f32 %v622_v13, 0.0  ;;  %v466_v19 = vsub.f32 2.0, %v434_v27  ;;  %v2402_v38 = vsel %vm690_vm9, 1.0, %v3604_v1  ;;  %v450_v30 = vmul.f32 2.0, %v2257_v47 }
 0x12c   : > { %3612 = vst [vmem:[#allocation37_spill] sm:$0xff] %v2394_v41  ;;  %3613 = vst [vmem:[#allocation38_spill] sm:$0xff] %v2402_v38  ;;  %v638_v2 = vsub.f32 1.0, %v606_v40  ;;  %1893 = vrsqrt.f32 %v529_v43  ;;  %v545_v22 = vadd.f32 1e-12, %v2397_v35  ;;  %vm706_vm10 = vcmp.gt.f32.partialorder %v2257_v47, 0.5 }
 0x12d   : > { %v2407_v46 = vmax.f32 %v466_v19, 0.0  ;;  %v482_v3 = vsub.f32 2.0, %v450_v30  ;;  %v2410_v61 = vsel %vm706_vm10, 1.0, %v3604_v1  ;;  %v435_v63 = vmul.f32 2.0, %v2270_v14 }
 0x12e   : > { %3614 = vst [vmem:[#allocation39_spill] sm:$0xff] %v2410_v61  ;;  %v1886_v33 = vpop.eup %1885  ;;  %v2413_v7 = vmax.f32 %v638_v2, 0.0  ;;  %1895 = vrsqrt.f32 %v545_v22  ;;  %vm691_vm11 = vcmp.gt.f32.partialorder %v2270_v14, 0.5  ;;  %v451_v13 = vmul.f32 2.0, %v2275_v21 }
 0x12f   : > { %v591_v27 = vmul.f32 %v1886_v33, %v2351_v62  ;;  %v530_v47 = vadd.f32 1e-12, %v2407_v46  ;;  %v2419_v40 = vmax.f32 %v482_v3, 0.0  ;;  %v467_v43 = vsub.f32 2.0, %v435_v63 }
 0x130   : > { %3615 = vst [vmem:[#allocation40_spill] sm:$0xff] %v2413_v7  ;;  %v1888_v19 = vpop.eup %1887  ;;  %v2422_v30 = vsel %vm691_vm11, 1.0, %v3604_v1  ;;  %v483_v61 = vsub.f32 2.0, %v451_v13  ;;  %vm707_vm12 = vcmp.gt.f32.partialorder %v2275_v21, 0.5  ;;  %v436_v2 = vmul.f32 2.0, %v2277_v42 }
 0x131   : > { %3616 = vst [vmem:[#allocation41_spill] sm:$0xff] %v2422_v30  ;;  %v1890_v22 = vpop.eup %1889  ;;  %v623_v14 = vsub.f32 1.0, %v591_v27  ;;  %v607_v6 = vmul.f32 %v1888_v19, %v2360_v23  ;;  %1897 = vrsqrt.f32 %v530_v47  ;;  %v546_v62 = vadd.f32 1e-12, %v2419_v40 }
 0x132   : > { %v592_v3 = vmul.f32 %v1890_v22, %v2366_v18  ;;  %v2429_v33 = vmax.f32 %v467_v43, 0.0  ;;  %v2431_v63 = vmax.f32 %v483_v61, 0.0  ;;  %v2434_v45 = vsel %vm707_vm12, 1.0, %v3604_v1 }
 0x133   : > { %3617 = vst [vmem:[#allocation42_spill] sm:$0xff] %v2434_v45  ;;  %v1892_v13 = vpop.eup %1891  ;;  %v2436_v21 = vmax.f32 %v623_v14, 0.0  ;;  %v639_v15 = vsub.f32 1.0, %v607_v6  ;;  %1899 = vrsqrt.f32 %v546_v62  ;;  %v468_v27 = vsub.f32 2.0, %v436_v2 }
 0x134   : > { %v624_v5 = vsub.f32 1.0, %v592_v3  ;;  %v608_v23 = vmul.f32 %v1892_v13, %v2377_v28  ;;  %v531_v47 = vadd.f32 1e-12, %v2429_v33  ;;  %v547_v18 = vadd.f32 1e-12, %v2431_v63 }
 0x135   : > { %3618 = vst [vmem:[#allocation43_spill] sm:$0xff] %v2436_v21  ;;  %v2441_v43 = vmax.f32 %v639_v15, 0.0  ;;  %v2443_v61 = vmax.f32 %v468_v27, 0.0  ;;  %vm692_vm13 = vcmp.gt.f32.partialorder %v2277_v42, 0.5  ;;  %v452_v19 = vmul.f32 2.0, %v2284_v49 }
 0x136   : > { %v1894_v22 = vpop.eup %1893  ;;  %v2447_v14 = vmax.f32 %v624_v5, 0.0  ;;  %v640_v6 = vsub.f32 1.0, %v608_v23  ;;  %1901 = vrsqrt.f32 %v531_v47  ;;  %v2450_v2 = vsel %vm692_vm13, 1.0, %v3604_v1 }
 0x137   : > { %3619 = vst [vmem:[#allocation44_spill] sm:$0xff] %v2441_v43  ;;  %3621 = vst [vmem:[#allocation46_spill] sm:$0xff] %v2450_v2  ;;  %v593_v28 = vmul.f32 %v1894_v22, %v2387_v29  ;;  %1903 = vrsqrt.f32 %v547_v18  ;;  %v532_v15 = vadd.f32 1e-12, %v2443_v61  ;;  %v484_v62 = vsub.f32 2.0, %v452_v19 }
 0x138   : > { %3620 = vst [vmem:[#allocation45_spill] sm:$0xff] %v2447_v14  ;;  %v1896_v3 = vpop.eup %1895  ;;  %v2454_v13 = vmax.f32 %v640_v6, 0.0  ;;  %vm708_vm14 = vcmp.gt.f32.partialorder %v2284_v49, 0.5  ;;  %v437_v42 = vmul.f32 2.0, %v2286_v31  ;;  %vm693_vm15 = vcmp.gt.f32.partialorder %v2286_v31, 0.5 }
 0x139   : > { %v625_v5 = vsub.f32 1.0, %v593_v28  ;;  %v609_v27 = vmul.f32 %v1896_v3, %v2397_v35  ;;  %1905 = vrsqrt.f32 %v532_v15  ;;  %v516_v23 = vmax.f32 %v484_v62, 0.0 }
 0x13a   : > { %3622 = vst [vmem:[#allocation47_spill] sm:$0xff] %v2454_v13  ;;  %v2461_v29 = vsel %vm708_vm14, 1.0, %v3604_v1  ;;  %v469_v47 = vsub.f32 2.0, %v437_v42  ;;  %v2464_v18 = vsel %vm693_vm15, 1.0, %v3604_v1  ;;  %v453_v19 = vmul.f32 2.0, %v2294_v48 }
 0x13b   : > { %3623 = vst [vmem:[#allocation48_spill] sm:$0xff] %v2461_v29  ;;  %3624 = vst [vmem:[#allocation49_spill] sm:$0xff] %v2464_v18  ;;  %v1898_v22 = vpop.eup %1897  ;;  %v2467_v49 = vmax.f32 %v625_v5, 0.0  ;;  %v641_v6 = vsub.f32 1.0, %v609_v27  ;;  %v548_v45 = vadd.f32 1e-12, %v516_v23 }
 0x13c   : > { %vm709_vm1 = vcmp.gt.f32.partialorder %v2294_v48, 0.5  ;;  %v594_v31 = vmul.f32 %v1898_v22, %v2407_v46  ;;  %v501_v35 = vmax.f32 %v469_v47, 0.0  ;;  %v485_v28 = vsub.f32 2.0, %v453_v19 }
 0x13d   : > { %3625 = vst [vmem:[#allocation50_spill] sm:$0xff] %v2467_v49  ;;  %v2472_v15 = vsel %vm709_vm1, 1.0, %v3604_v1  ;;  %v1900_v62 = vpop.eup %1899  ;;  %v2474_v3 = vmax.f32 %v641_v6, 0.0  ;;  %1907 = vrsqrt.f32 %v548_v45  ;;  %v438_v42 = vmul.f32 2.0, %v2296_v51 }
 0x13e   : > { %3626 = vst [vmem:[#allocation51_spill] sm:$0xff] %v2472_v15  ;;  %vm694_vm2 = vcmp.gt.f32.partialorder %v2296_v51, 0.5  ;;  %v626_v5 = vsub.f32 1.0, %v594_v31  ;;  %v610_v27 = vmul.f32 %v1900_v62, %v2419_v40  ;;  %v533_v29 = vadd.f32 1e-12, %v501_v35 }
 0x13f   : > { %3627 = vst [vmem:[#allocation52_spill] sm:$0xff] %v2474_v3  ;;  %v517_v48 = vmax.f32 %v485_v28, 0.0  ;;  %v470_v50 = vsub.f32 2.0, %v438_v42  ;;  %v2480_v46 = vsel %vm694_vm2, 1.0, %v3604_v1  ;;  %v454_v47 = vmul.f32 2.0, %v2303_v56 }
 0x140   : > { %3628 = vst [vmem:[#allocation53_spill] sm:$0xff] %v2480_v46  ;;  %vm710_vm3 = vcmp.gt.f32.partialorder %v2303_v56, 0.5  ;;  %v1902_v19 = vpop.eup %1901  ;;  %v2484_v22 = vmax.f32 %v626_v5, 0.0  ;;  %v642_v45 = vsub.f32 1.0, %v610_v27  ;;  %1909 = vrsqrt.f32 %v533_v29 }
 0x141   : > { %v549_v6 = vadd.f32 1e-12, %v517_v48  ;;  %v1904_v51 = vpop.eup %1903  ;;  %v595_v31 = vmul.f32 %v1902_v19, %v2429_v33  ;;  %v502_v40 = vmax.f32 %v470_v50, 0.0  ;;  %v486_v62 = vsub.f32 2.0, %v454_v47 }
 0x142   : > { %3629 = vst [vmem:[#allocation54_spill] sm:$0xff] %v2484_v22  ;;  %v2488_v28 = vsel %vm710_vm3, 1.0, %v3604_v1  ;;  %v2490_v42 = vmax.f32 %v642_v45, 0.0  ;;  %v611_v15 = vmul.f32 %v1904_v51, %v2431_v63 }
 0x143   : > { %3630 = vst [vmem:[#allocation55_spill] sm:$0xff] %v2488_v28  ;;  %1911 = vrsqrt.f32 %v549_v6  ;;  %v1906_v56 = vpop.eup %1905  ;;  %v627_v36 = vsub.f32 1.0, %v595_v31  ;;  %v534_v5 = vadd.f32 1e-12, %v502_v40  ;;  %v518_v26 = vmax.f32 %v486_v62, 0.0 }
 0x144   : > { %3631 = vst [vmem:[#allocation56_spill] sm:$0xff] %v2490_v42  ;;  %v643_v27 = vsub.f32 1.0, %v611_v15  ;;  %v596_v29 = vmul.f32 %v1906_v56, %v2443_v61 }
 0x145   : > { %v2494_v46 = vmax.f32 %v627_v36, 0.0  ;;  %1913 = vrsqrt.f32 %v534_v5  ;;  %v550_v50 = vadd.f32 1e-12, %v518_v26 }
 0x146   : > { %v2496_v33 = vmax.f32 %v643_v27, 0.0  ;;  %v628_v1 = vsub.f32 1.0, %v596_v29 }
 0x147   : > { %3632 = vst [vmem:[#allocation57_spill] sm:$0xff] %v2494_v46  ;;  %v1908_v47 = vpop.eup %1907  ;;  %1915 = vrsqrt.f32 %v550_v50 }
 0x148   : > { %3633 = vst [vmem:[#allocation58_spill] sm:$0xff] %v2496_v33  ;;  %v2498_v19 = vmax.f32 %v628_v1, 0.0  ;;  %v612_v63 = vmul.f32 %v1908_v47, %v516_v23 }
 0x14a   : > { %3634 = vst [vmem:[#allocation59_spill] sm:$0xff] %v2498_v19  ;;  %v1910_v45 = vpop.eup %1909  ;;  %v644_v6 = vsub.f32 1.0, %v612_v63 }
 0x14b   : > { %v597_v51 = vmul.f32 %v1910_v45, %v501_v35 }
 0x14c   : > { %v2500_v62 = vmax.f32 %v644_v6, 0.0 }
 0x14d   : > { %v1912_v31 = vpop.eup %1911  ;;  %v629_v15 = vsub.f32 1.0, %v597_v51 }
 0x14e   : > { %3635 = vst [vmem:[#allocation60_spill] sm:$0xff] %v2500_v62  ;;  %v613_v61 = vmul.f32 %v1912_v31, %v517_v48 }
 0x14f   : > { %v1914_v36 = vpop.eup %1913  ;;  %v2502_v56 = vmax.f32 %v629_v15, 0.0 }
 0x150   : > { %v645_v5 = vsub.f32 1.0, %v613_v61  ;;  %v598_v27 = vmul.f32 %v1914_v36, %v502_v40 }
 0x151   : > { %3636 = vst [vmem:[#allocation61_spill] sm:$0xff] %v2502_v56  ;;  %v1916_v28 = vpop.eup %1915 }
 0x152   : > { %v2504_v29 = vmax.f32 %v645_v5, 0.0  ;;  %v630_v50 = vsub.f32 1.0, %v598_v27  ;;  %v614_v1 = vmul.f32 %v1916_v28, %v518_v26  ;;  %797 = sbr.rel (!%p2162_p4) target bundleno = 496 (0x1f0), region = 36 }
 0x154   : > { %3637 = vst [vmem:[#allocation62_spill] sm:$0xff] %v2504_v29  ;;  %v2506_v18 = vmax.f32 %v630_v50, 0.0  ;;  %v646_v23 = vsub.f32 1.0, %v614_v1 }
 0x156   : > { %3638 = vst [vmem:[#allocation63_spill] sm:$0xff] %v2506_v18  ;;  %v2508_v47 = vmax.f32 %v646_v23, 0.0 }
 0x158   : > { %3639 = vst [vmem:[#allocation64_spill] sm:$0xff] %v2508_v47 }
 0x159   : > { %v3640_v35 = vlaneseq  ;;  %v2521_v26 = vstv %s2158_s27 }
 0x15b   : > { %v2513_v48 = vshrl.u32 %v3640_v35, 7  ;;  %v2516_v63 = vand.u32 127, %v3640_v35 }
 0x15d   : > { %3641 = vst [vmem:[#allocation65_spill] sm:$0xff] %v2513_v48  ;;  %v800_v40 = vadd.s32 8, %v2513_v48  ;;  %v801_v45 = vadd.s32 16, %v2513_v48  ;;  %v802_v28 = vadd.s32 24, %v2513_v48  ;;  %v803_v6 = vadd.s32 32, %v2513_v48 }
 0x15e   : > { %v804_v51 = vadd.s32 40, %v2513_v48  ;;  %v2527_v31 = vadd.s32 128, %v2516_v63  ;;  %v805_v15 = vadd.s32 48, %v2513_v48  ;;  %v806_v61 = vadd.s32 56, %v2513_v48 }
 0x15f   : > { %v807_v36 = vadd.s32 64, %v2513_v48  ;;  %v808_v5 = vadd.s32 72, %v2513_v48  ;;  %v809_v27 = vadd.s32 80, %v2513_v48  ;;  %v810_v50 = vadd.s32 88, %v2513_v48 }
 0x160   : > { %v2536_v1 = vadd.s32 96, %v2513_v48  ;;  %v2539_v23 = vadd.s32 104, %v2513_v48  ;;  %v2542_v35 = vadd.s32 112, %v2513_v48  ;;  %v2545_v2 = vadd.s32 120, %v2513_v48 }
 0x161   : > { %v818_v30 = vsub.s32 %v2513_v48, %v2516_v63  ;;  %v820_v38 = vsub.s32 %v800_v40, %v2516_v63  ;;  %v819_v17 = vsub.s32 %v2513_v48, %v2527_v31  ;;  %v821_v0 = vsub.s32 %v800_v40, %v2527_v31 }
 0x162   : > { %v822_v4 = vsub.s32 %v801_v45, %v2516_v63  ;;  %v824_v16 = vsub.s32 %v802_v28, %v2516_v63  ;;  %v823_v53 = vsub.s32 %v801_v45, %v2527_v31  ;;  %v825_v47 = vsub.s32 %v802_v28, %v2527_v31 }
 0x163   : > { %v826_v25 = vsub.s32 %v803_v6, %v2516_v63  ;;  %v827_v29 = vsub.s32 %v803_v6, %v2527_v31  ;;  %v828_v12 = vsub.s32 %v804_v51, %v2516_v63  ;;  %v829_v62 = vsub.s32 %v804_v51, %v2527_v31 }
 0x164   : > { %v830_v48 = vsub.s32 %v805_v15, %v2516_v63  ;;  %v831_v40 = vsub.s32 %v805_v15, %v2527_v31  ;;  %v832_v58 = vsub.s32 %v806_v61, %v2516_v63  ;;  %v833_v33 = vsub.s32 %v806_v61, %v2527_v31 }
 0x165   : > { %v834_v45 = vsub.s32 %v807_v36, %v2516_v63  ;;  %v835_v28 = vsub.s32 %v807_v36, %v2527_v31  ;;  %v836_v44 = vsub.s32 %v808_v5, %v2516_v63  ;;  %v837_v6 = vsub.s32 %v808_v5, %v2527_v31 }
 0x166   : > { %v838_v42 = vsub.s32 %v809_v27, %v2516_v63  ;;  %v839_v51 = vsub.s32 %v809_v27, %v2527_v31  ;;  %v840_v32 = vsub.s32 %v810_v50, %v2516_v63  ;;  %v841_v15 = vsub.s32 %v810_v50, %v2527_v31 }
 0x167   : > { %v842_v3 = vsub.s32 %v2536_v1, %v2516_v63  ;;  %v843_v61 = vsub.s32 %v2536_v1, %v2527_v31  ;;  %v844_v36 = vsub.s32 %v2539_v23, %v2516_v63  ;;  %v845_v5 = vsub.s32 %v2539_v23, %v2527_v31 }
 0x168   : > { %v846_v20 = vsub.s32 %v2542_v35, %v2516_v63  ;;  %v847_v27 = vsub.s32 %v2542_v35, %v2527_v31  ;;  %v848_v50 = vsub.s32 %v2545_v2, %v2516_v63  ;;  %v849_v13 = vsub.s32 %v2545_v2, %v2527_v31 }
 0x169   : > { %v2590_v1 = vadd.s32 %v2521_v26, %v818_v30  ;;  %v2593_v43 = vadd.s32 %v2521_v26, %v819_v17  ;;  %v2596_v23 = vadd.s32 %v2521_v26, %v820_v38  ;;  %v2599_v7 = vadd.s32 %v2521_v26, %v821_v0 }
 0x16a   : > { %v2602_v35 = vadd.s32 %v2521_v26, %v822_v4  ;;  %v2605_v63 = vadd.s32 %v2521_v26, %v823_v53  ;;  %v2608_v2 = vadd.s32 %v2521_v26, %v824_v16  ;;  %v2611_v30 = vadd.s32 %v2521_v26, %v825_v47 }
 0x16b   : > { %v2614_v17 = vadd.s32 %v2521_v26, %v826_v25  ;;  %v2617_v38 = vadd.s32 %v2521_v26, %v827_v29  ;;  %v2620_v0 = vadd.s32 %v2521_v26, %v828_v12  ;;  %v2623_v4 = vadd.s32 %v2521_v26, %v829_v62 }
 0x16c   : > { %v2626_v53 = vadd.s32 %v2521_v26, %v830_v48  ;;  %v2629_v16 = vadd.s32 %v2521_v26, %v831_v40  ;;  %v2632_v47 = vadd.s32 %v2521_v26, %v832_v58  ;;  %v2635_v25 = vadd.s32 %v2521_v26, %v833_v33 }
 0x16d   : > { %v2638_v29 = vadd.s32 %v2521_v26, %v834_v45  ;;  %v2641_v12 = vadd.s32 %v2521_v26, %v835_v28  ;;  %v2644_v62 = vadd.s32 %v2521_v26, %v836_v44  ;;  %v2647_v48 = vadd.s32 %v2521_v26, %v837_v6 }
 0x16e   : > { %v2650_v31 = vadd.s32 %v2521_v26, %v838_v42  ;;  %v2653_v58 = vadd.s32 %v2521_v26, %v839_v51  ;;  %v2656_v33 = vadd.s32 %v2521_v26, %v840_v32  ;;  %v2659_v40 = vadd.s32 %v2521_v26, %v841_v15 }
 0x16f   : > { %v2662_v45 = vadd.s32 %v2521_v26, %v842_v3  ;;  %v917_v44 = vsub.s32 0, %v2590_v1  ;;  %v2666_v28 = vadd.s32 %v2521_v26, %v843_v61  ;;  %v2669_v42 = vadd.s32 %v2521_v26, %v844_v36 }
 0x170   : > { %3642 = vst [vmem:[#allocation66_spill] sm:$0xff] %v2653_v58  ;;  %v2672_v6 = vadd.s32 %v2521_v26, %v845_v5  ;;  %v920_v32 = vsub.s32 0, %v2593_v43  ;;  %v2676_v51 = vadd.s32 %v2521_v26, %v846_v20  ;;  %v2679_v15 = vadd.s32 %v2521_v26, %v847_v27 }
 0x171   : > { %v2682_v3 = vadd.s32 %v2521_v26, %v848_v50  ;;  %v923_v61 = vsub.s32 0, %v2596_v23  ;;  %v2686_v41 = vadd.s32 %v2521_v26, %v849_v13  ;;  %vm884_vm4 = vcmp.eq.s32.totalorder %v2590_v1, 0 }
 0x172   : > { %v926_v36 = vsub.s32 0, %v2599_v7  ;;  %v929_v5 = vsub.s32 0, %v2602_v35  ;;  %vm885_vm5 = vcmp.eq.s32.totalorder %v2593_v43, 0  ;;  %vm886_vm6 = vcmp.eq.s32.totalorder %v2596_v23, 0 }
 0x173   : > { %vm887_vm7 = vcmp.eq.s32.totalorder %v2599_v7, 0  ;;  %v1695_v20 = vmin.u32 %v917_v44, %v2590_v1  ;;  %vm888_vm8 = vcmp.eq.s32.totalorder %v2602_v35, 0  ;;  %v1696_v27 = vmin.u32 %v920_v32, %v2593_v43 }
 0x174   : > { %v932_v13 = vsub.s32 0, %v2605_v63  ;;  %v935_v26 = vsub.s32 0, %v2608_v2  ;;  %vm889_vm9 = vcmp.eq.s32.totalorder %v2605_v63, 0  ;;  %vm890_vm10 = vcmp.eq.s32.totalorder %v2608_v2, 0 }
 0x175   : > { %v1697_v50 = vmin.u32 %v923_v61, %v2596_v23  ;;  %v938_v55 = vsub.s32 0, %v2611_v30  ;;  %v1698_v44 = vmin.u32 %v926_v36, %v2599_v7  ;;  %v1699_v8 = vmin.u32 %v929_v5, %v2602_v35 }
 0x176   : > { %v941_v32 = vsub.s32 0, %v2614_v17  ;;  %v944_v57 = vsub.s32 0, %v2617_v38  ;;  %v947_v59 = vsub.s32 0, %v2620_v0  ;;  %v950_v37 = vsub.s32 0, %v2623_v4 }
 0x177   : > { %vm1012_vm13 = vcmp.eq.s32.totalorder %v1695_v20, 128  ;;  %v1700_v61 = vmin.u32 %v932_v13, %v2605_v63  ;;  %v1701_v39 = vmin.u32 %v935_v26, %v2608_v2  ;;  %vm1013_vm15 = vcmp.eq.s32.totalorder %v1696_v27, 128 }
 0x178   : > { %v1702_v36 = vmin.u32 %v938_v55, %v2611_v30  ;;  %v953_v5 = vsub.s32 0, %v2626_v53  ;;  %v956_v18 = vsub.s32 0, %v2629_v16  ;;  %vm1014_vm2 = vcmp.eq.s32.totalorder %v1697_v50, 128  ;;  %vm2725_vm1 = vmor %vm884_vm4, %vm1012_vm13 }
 0x179   : > { %v1703_v56 = vmin.u32 %v941_v32, %v2614_v17  ;;  %v959_v19 = vsub.s32 0, %v2632_v47  ;;  %v962_v13 = vsub.s32 0, %v2635_v25  ;;  %vm1015_vm14 = vcmp.eq.s32.totalorder %v1698_v44, 128  ;;  %vm2736_vm11 = vmor %vm885_vm5, %vm1013_vm15 }
 0x17a   : > { %v1704_v55 = vmin.u32 %v944_v57, %v2617_v38  ;;  %v1705_v46 = vmin.u32 %v947_v59, %v2620_v0  ;;  %v1706_v32 = vmin.u32 %v950_v37, %v2623_v4  ;;  %vm1016_vm3 = vcmp.eq.s32.totalorder %v1699_v8, 128  ;;  %vm2747_vm12 = vmor %vm886_vm6, %vm1014_vm2 }
 0x17b   : > { %v965_v1 = vsub.s32 0, %v2638_v29  ;;  %v968_v22 = vsub.s32 0, %v2641_v12  ;;  %v971_v57 = vsub.s32 0, %v2644_v62  ;;  %vm1017_vm13 = vcmp.eq.s32.totalorder %v1700_v61, 128  ;;  %vm2760_vm4 = vmor %vm887_vm7, %vm1015_vm14 }
 0x17c   : > { %v1707_v59 = vmin.u32 %v953_v5, %v2626_v53  ;;  %v2754_v43 = vmin.u32 %v956_v18, %v2629_v16  ;;  %v974_v27 = vsub.s32 0, %v2647_v48  ;;  %vm1018_vm15 = vcmp.eq.s32.totalorder %v1701_v39, 128  ;;  %vm2775_vm5 = vmor %vm888_vm8, %vm1016_vm3 }
 0x17d   : > { %v2766_v23 = vmin.u32 %v959_v19, %v2632_v47  ;;  %v2769_v5 = vmin.u32 %v962_v13, %v2635_v25  ;;  %v977_v18 = vsub.s32 0, %v2650_v31  ;;  %vm1019_vm2 = vcmp.eq.s32.totalorder %v1702_v36, 128  ;;  %vm2786_vm6 = vmor %vm889_vm9, %vm1017_vm13 }
 0x17e   : > { %v980_v44 = vsub.s32 0, %v2653_v58  ;;  %v983_v19 = vsub.s32 0, %v2656_v33  ;;  %v986_v49 = vsub.s32 0, %v2659_v40  ;;  %vm1020_vm14 = vcmp.eq.s32.totalorder %v1703_v56, 128  ;;  %vm2803_vm7 = vmor %vm890_vm10, %vm1018_vm15 }
 0x17f   : > { %v2792_v35 = vmin.u32 %v965_v1, %v2638_v29  ;;  %v2795_v13 = vmin.u32 %v968_v22, %v2641_v12  ;;  %v2798_v14 = vmin.u32 %v971_v57, %v2644_v62  ;;  %v2809_v61 = vmin.u32 %v974_v27, %v2647_v48 }
 0x180   : > { %v989_v1 = vsub.s32 0, %v2662_v45  ;;  %v992_v22 = vsub.s32 0, %v2666_v28  ;;  %vm3657_vm8 = vcmp.eq.s32.totalorder %v2611_v30, 0  ;;  %v2822_v2 = vmin.u32 %v977_v18, %v2650_v31 }
 0x181   : > { %vm2816_vm3 = vmor %vm3657_vm8, %vm1019_vm2  ;;  %v995_v57 = vsub.s32 0, %v2669_v42  ;;  %v998_v27 = vsub.s32 0, %v2672_v6  ;;  %vm3660_vm9 = vcmp.eq.s32.totalorder %v2614_v17, 0  ;;  %v3661_v36 = vmov 0 }
 0x182   : > { %vm2829_vm13 = vmor %vm3660_vm9, %vm1020_vm14  ;;  %v2835_v30 = vmin.u32 %v980_v44, %v2653_v58  ;;  %v2838_v18 = vmin.u32 %v983_v19, %v2656_v33  ;;  %v1001_v21 = vsub.s32 0, %v2676_v51  ;;  %vm3663_vm10 = vcmp.eq.s32.totalorder %v1704_v55, 128 }
 0x183   : > { %v3662_v36 = vsel %vm2829_vm13, 4294967295, %v3661_v36  ;;  %vm3664_vm15 = vcmp.eq.s32.totalorder %v2617_v38, 0  ;;  %v3665_v56 = vmov 0  ;;  %v2850_v17 = vmin.u32 %v986_v49, %v2659_v40 }
 0x184   : > { %vm2844_vm0 = vmor %vm3664_vm15, %vm3663_vm10  ;;  %v1004_v44 = vsub.s32 0, %v2679_v15  ;;  %v1007_v19 = vsub.s32 0, %v2682_v3  ;;  %vm3667_vm2 = vcmp.eq.s32.totalorder %v1705_v46, 128  ;;  %vm3668_vm8 = vcmp.eq.s32.totalorder %v2620_v0, 0  ;;  %v3730_v46 = vld [vmem:[#allocation50_spill] sm:$0xff] }
 0x185   : > { %v3666_v56 = vsel %vm2844_vm0, 4294967295, %v3665_v56  ;;  %vm2858_vm13 = vmor %vm3668_vm8, %vm3667_vm2  ;;  %v3669_v38 = vmov 0  ;;  %v2864_v55 = vmin.u32 %v989_v1, %v2662_v45  ;;  %v2867_v49 = vmin.u32 %v992_v22, %v2666_v28 }
 0x186   : > { %v3670_v38 = vsel %vm2858_vm13, 4294967295, %v3669_v38  ;;  %v1010_v58 = vsub.s32 0, %v2686_v41  ;;  %vm3671_vm14 = vcmp.eq.s32.totalorder %v1706_v32, 128  ;;  %vm3672_vm9 = vcmp.eq.s32.totalorder %v2623_v4, 0 }
 0x187   : > { %vm2874_vm0 = vmor %vm3672_vm9, %vm3671_vm14  ;;  %vm2031_vm2 = vmmov 1   ;;  %v2883_v0 = vmin.u32 %v995_v57, %v2669_v42  ;;  %v2886_v1 = vmin.u32 %v998_v27, %v2672_v6  ;;  %vm3675_vm13 = vcmp.eq.s32.totalorder %v1707_v59, 128 }
 0x188   : > { %vm1076_vm8 = vmxor %vm2725_vm1, %vm2031_vm2  ;;  %vm3676_vm14 = vcmp.eq.s32.totalorder %v2626_v53, 0  ;;  %v3677_v4 = vmov 0  ;;  %v2032_v26 = vmov 0.0   ;;  %v2904_v22 = vmin.u32 %v1001_v21, %v2676_v51  ;;  %v3740_v53 = vld [vmem:[#allocation57_spill] sm:$0xff] }
 0x189   : > { %vm2892_vm9 = vmor %vm3676_vm14, %vm3675_vm13  ;;  %v2900_v32 = vsel %vm1076_vm8, 1.0, %v2032_v26  ;;  %vm3679_vm13 = vcmp.eq.s32.totalorder %v2754_v43, 128  ;;  %vm3680_vm14 = vcmp.eq.s32.totalorder %v2629_v16, 0  ;;  %v2925_v59 = vmin.u32 %v1004_v44, %v2679_v15  ;;  %v3745_v16 = vld [vmem:[#allocation59_spill] sm:$0xff] }
 0x18a   : > { %v3678_v4 = vsel %vm2892_vm9, 4294967295, %v3677_v4  ;;  %vm1077_vm1 = vmxor %vm2736_vm11, %vm2031_vm2  ;;  %v1172_v21 = vmul.f32 %v2900_v32, %v2267_v9  ;;  %vm3684_vm10 = vcmp.eq.s32.totalorder %v2632_v47, 0  ;;  %vm3688_vm8 = vcmp.eq.s32.totalorder %v2635_v25, 0  ;;  %v3750_v47 = vld [vmem:[#allocation61_spill] sm:$0xff]  ;;  %v3755_v25 = vld [vmem:[#allocation63_spill] sm:$0xff] }
 0x18b   : > { %vm2911_vm9 = vmor %vm3680_vm14, %vm3679_vm13  ;;  %v2919_v20 = vsel %vm1077_vm1, 1.0, %v2032_v26  ;;  %vm3683_vm14 = vcmp.eq.s32.totalorder %v2766_v23, 128  ;;  %v2946_v23 = vmin.u32 %v1007_v19, %v2682_v3  ;;  %vm3692_vm1 = vcmp.eq.s32.totalorder %v2638_v29, 0  ;;  %v3760_v29 = vld [vmem:[#allocation21_spill] sm:$0xff] }
 0x18c   : > { %vm1078_vm11 = vmxor %vm2747_vm12, %vm2031_vm2  ;;  %v1173_v43 = vmul.f32 %v2919_v20, %v2279_v24 }
 0x18d   : > { %vm2932_vm15 = vmor %vm3684_vm10, %vm3683_vm14  ;;  %v2940_v37 = vsel %vm1078_vm11, 1.0, %v2032_v26  ;;  %vm3687_vm14 = vcmp.eq.s32.totalorder %v2769_v5, 128  ;;  %v2967_v5 = vmin.u32 %v1010_v58, %v2686_v41 }
 0x18e   : > { %vm1079_vm12 = vmxor %vm2760_vm4, %vm2031_vm2  ;;  %v1174_v57 = vmul.f32 %v2940_v37, %v2298_v34 }
 0x18f   : > { %vm2953_vm13 = vmor %vm3688_vm8, %vm3687_vm14  ;;  %v2961_v50 = vsel %vm1079_vm12, 1.0, %v2032_v26  ;;  %vm3691_vm14 = vcmp.eq.s32.totalorder %v2792_v35, 128  ;;  %vm3695_vm8 = vcmp.eq.s32.totalorder %v2795_v13, 128 }
 0x190   : > { %vm1080_vm4 = vmxor %vm2775_vm5, %vm2031_vm2  ;;  %v1175_v58 = vmul.f32 %v2961_v50, %v2323_v10  ;;  %v1237_v27 = vadd.f32 %v1174_v57, %v1172_v21 }
 0x191   : > { %vm2974_vm10 = vmor %vm3692_vm1, %vm3691_vm14  ;;  %v2982_v7 = vsel %vm1080_vm4, 1.0, %v2032_v26  ;;  %vm3696_vm1 = vcmp.eq.s32.totalorder %v2641_v12, 0  ;;  %vm3713_vm4 = vcmp.eq.s32.totalorder %v2835_v30, 128  ;;  %v3722_v30 = vmov 0  ;;  %v3766_v12 = vld [vmem:[#allocation22_spill] sm:$0xff] }
 0x192   : > { %vm1081_vm5 = vmxor %vm2786_vm6, %vm2031_vm2  ;;  %v1176_v35 = vmul.f32 %v2982_v7, %v2334_v11  ;;  %v1258_v44 = vadd.f32 %v1175_v58, %v1173_v43  ;;  %v3719_v43 = vld [vmem:[#allocation43_spill] sm:$0xff] }
 0x193   : > { %vm2992_vm14 = vmor %vm3696_vm1, %vm3695_vm8  ;;  %v3000_v8 = vsel %vm1081_vm5, 1.0, %v2032_v26  ;;  %vm3699_vm8 = vcmp.eq.s32.totalorder %v2798_v14, 128  ;;  %vm3700_vm1 = vcmp.eq.s32.totalorder %v2644_v62, 0  ;;  %v3705_v14 = vmov 0 }
 0x194   : > { %vm1082_vm6 = vmxor %vm2803_vm7, %vm2031_vm2  ;;  %v1177_v63 = vmul.f32 %v3000_v8, %v2345_v54  ;;  %v1238_v19 = vadd.f32 %v1237_v27, %v1176_v35  ;;  %vm3720_vm5 = vcmp.eq.s32.totalorder %v2838_v18, 128  ;;  %v3724_v35 = vld [vmem:[#allocation45_spill] sm:$0xff] }
 0x195   : > { %vm3010_vm11 = vmor %vm3700_vm1, %vm3699_vm8  ;;  %v3018_v13 = vsel %vm1082_vm6, 1.0, %v2032_v26  ;;  %vm3703_vm8 = vcmp.eq.s32.totalorder %v2809_v61, 128  ;;  %vm3704_vm1 = vcmp.eq.s32.totalorder %v2647_v48, 0  ;;  %v3710_v48 = vmov 0 }
 0x196   : > { %vm1083_vm7 = vmxor %vm2816_vm3, %vm2031_vm2  ;;  %vm3707_vm3 = vnez %v3662_v36  ;;  %v1178_v39 = vmul.f32 %v3018_v13, %v2374_v52  ;;  %v1259_v21 = vadd.f32 %v1258_v44, %v1177_v63 }
 0x197   : > { %vm3028_vm12 = vmor %vm3704_vm1, %vm3703_vm8  ;;  %v3036_v62 = vsel %vm1083_vm7, 1.0, %v2032_v26  ;;  %vm3708_vm8 = vcmp.eq.s32.totalorder %v2822_v2, 128  ;;  %vm3709_vm1 = vcmp.eq.s32.totalorder %v2650_v31, 0  ;;  %vm3712_vm7 = vnez %v3666_v56  ;;  %v3714_v31 = vld [vmem:[#allocation66_spill] sm:$0xff] }
 0x198   : > { %v3706_v14 = vsel %vm3028_vm12, 4294967295, %v3705_v14  ;;  %vm1084_vm6 = vmxor %vm3707_vm3, %vm2031_vm2  ;;  %v1179_v36 = vmul.f32 %v3036_v62, %v2399_v60  ;;  %v1239_v58 = vadd.f32 %v1238_v19, %v1178_v39 }
 0x199   : > { %vm3046_vm12 = vmor %vm3709_vm1, %vm3708_vm8  ;;  %v3054_v61 = vsel %vm1084_vm6, 1.0, %v2032_v26  ;;  %vm3715_vm8 = vcmp.eq.s32.totalorder %v3714_v31, 0  ;;  %vm3725_vm6 = vcmp.eq.s32.totalorder %v2850_v17, 128 }
 0x19a   : > { %v3711_v48 = vsel %vm3046_vm12, 4294967295, %v3710_v48  ;;  %vm1085_vm3 = vmxor %vm3712_vm7, %vm2031_vm2  ;;  %vm3718_vm7 = vnez %v3670_v38  ;;  %v1180_v57 = vmul.f32 %v3054_v61, %v3719_v43  ;;  %v1260_v63 = vadd.f32 %v1259_v21, %v1179_v36 }
 0x19b   : > { %vm3063_vm1 = vmor %vm3715_vm8, %vm3713_vm4  ;;  %v3071_v56 = vsel %vm1085_vm3, 1.0, %v2032_v26  ;;  %vm3721_vm4 = vcmp.eq.s32.totalorder %v2656_v33, 0  ;;  %vm3731_vm3 = vcmp.eq.s32.totalorder %v2864_v55, 128 }
 0x19c   : > { %vm1086_vm12 = vmxor %vm3718_vm7, %vm2031_vm2  ;;  %v1181_v27 = vmul.f32 %v3071_v56, %v3724_v35  ;;  %v1240_v39 = vadd.f32 %v1239_v58, %v1180_v57 }
 0x19d   : > { %vm3080_vm8 = vmor %vm3721_vm4, %vm3720_vm5  ;;  %v3088_v38 = vsel %vm1086_vm12, 1.0, %v2032_v26  ;;  %vm3726_vm5 = vcmp.eq.s32.totalorder %v2659_v40, 0  ;;  %vm3736_vm12 = vcmp.eq.s32.totalorder %v2867_v49, 128 }
 0x19e   : > { %v3723_v30 = vsel %vm3080_vm8, 4294967295, %v3722_v30  ;;  %vm1087_vm7 = vmxor %vm2874_vm0, %vm2031_vm2  ;;  %vm3729_vm0 = vnez %v3678_v4  ;;  %v1182_v44 = vmul.f32 %v3088_v38, %v3730_v46  ;;  %v3735_v4 = vld [vmem:[#allocation54_spill] sm:$0xff]  ;;  %v1261_v36 = vadd.f32 %v1260_v63, %v1181_v27 }
 0x19f   : > { %vm3097_vm4 = vmor %vm3726_vm5, %vm3725_vm6  ;;  %v3105_v18 = vsel %vm1087_vm7, 1.0, %v2032_v26  ;;  %vm3732_vm6 = vcmp.eq.s32.totalorder %v2662_v45, 0  ;;  %vm3741_vm7 = vcmp.eq.s32.totalorder %v2883_v0, 128 }
 0x1a0   : > { %vm1088_vm8 = vmxor %vm3729_vm0, %vm2031_vm2  ;;  %v1183_v19 = vmul.f32 %v3105_v18, %v3735_v4  ;;  %v1241_v31 = vadd.f32 %v1240_v39, %v1182_v44 }
 0x1a1   : > { %vm3114_vm5 = vmor %vm3732_vm6, %vm3731_vm3  ;;  %v3122_v17 = vsel %vm1088_vm8, 1.0, %v2032_v26  ;;  %vm3737_vm3 = vcmp.eq.s32.totalorder %v2666_v28, 0  ;;  %vm3746_vm8 = vcmp.eq.s32.totalorder %v2886_v1, 128 }
 0x1a2   : > { %vm1089_vm0 = vmxor %vm2911_vm9, %vm2031_vm2  ;;  %v1184_v21 = vmul.f32 %v3122_v17, %v3740_v53  ;;  %v1262_v57 = vadd.f32 %v1261_v36, %v1183_v19 }
 0x1a3   : > { %vm3131_vm6 = vmor %vm3737_vm3, %vm3736_vm12  ;;  %v3139_v55 = vsel %vm1089_vm0, 1.0, %v2032_v26  ;;  %vm3742_vm12 = vcmp.eq.s32.totalorder %v2669_v42, 0  ;;  %v3748_v42 = vmov 0  ;;  %vm3751_vm0 = vcmp.eq.s32.totalorder %v2904_v22, 128 }
 0x1a4   : > { %vm1090_vm9 = vmxor %vm2932_vm15, %vm2031_vm2  ;;  %v1185_v43 = vmul.f32 %v3139_v55, %v3745_v16  ;;  %v1242_v35 = vadd.f32 %v1241_v31, %v1184_v21  ;;  %v3775_v31 = vld [vmem:[#allocation29_spill] sm:$0xff] }
 0x1a5   : > { %vm3148_vm3 = vmor %vm3742_vm12, %vm3741_vm7  ;;  %v3156_v49 = vsel %vm1090_vm9, 1.0, %v2032_v26  ;;  %vm3747_vm7 = vcmp.eq.s32.totalorder %v2672_v6, 0  ;;  %vm3757_vm9 = vcmp.eq.s32.totalorder %v2679_v15, 0 }
 0x1a6   : > { %vm1091_vm15 = vmxor %vm2953_vm13, %vm2031_vm2  ;;  %v1186_v58 = vmul.f32 %v3156_v49, %v3750_v47  ;;  %v1263_v63 = vadd.f32 %v1262_v57, %v1185_v43  ;;  %v3776_v57 = vld [vmem:[#allocation31_spill] sm:$0xff] }
 0x1a7   : > { %vm3165_vm12 = vmor %vm3747_vm7, %vm3746_vm8  ;;  %v3173_v0 = vsel %vm1091_vm15, 1.0, %v2032_v26  ;;  %vm3752_vm8 = vcmp.eq.s32.totalorder %v2676_v51, 0  ;;  %vm3756_vm15 = vcmp.eq.s32.totalorder %v2925_v59, 128  ;;  %v3758_v51 = vmov 0 }
 0x1a8   : > { %v3749_v42 = vsel %vm3165_vm12, 4294967295, %v3748_v42  ;;  %vm1092_vm13 = vmxor %vm2974_vm10, %vm2031_vm2  ;;  %v1187_v27 = vmul.f32 %v3173_v0, %v3755_v25  ;;  %v1243_v44 = vadd.f32 %v1242_v35, %v1186_v58  ;;  %v3777_v35 = vld [vmem:[#allocation37_spill] sm:$0xff] }
 0x1a9   : > { %vm3182_vm7 = vmor %vm3752_vm8, %vm3751_vm0  ;;  %v3190_v1 = vsel %vm1092_vm13, 1.0, %v2032_v26  ;;  %vm3762_vm13 = vcmp.eq.s32.totalorder %v2682_v3, 0 }
 0x1aa   : > { %vm1093_vm10 = vmxor %vm2992_vm14, %vm2031_vm2  ;;  %v1188_v46 = vmul.f32 %v3190_v1, %v3760_v29  ;;  %vm3761_vm14 = vcmp.eq.s32.totalorder %v2946_v23, 128  ;;  %v1264_v4 = vadd.f32 %v1263_v63, %v1187_v27  ;;  %v3778_v63 = vld [vmem:[#allocation40_spill] sm:$0xff] }
 0x1ab   : > { %vm3198_vm12 = vmor %vm3757_vm9, %vm3756_vm15  ;;  %v3206_v22 = vsel %vm1093_vm10, 1.0, %v2032_v26  ;;  %vm3765_vm9 = vnez %v3706_v14  ;;  %vm3768_vm10 = vcmp.eq.s32.totalorder %v2686_v41, 0  ;;  %v3772_v14 = vld [vmem:[#allocation24_spill] sm:$0xff] }
 0x1ac   : > { %v3759_v51 = vsel %vm3198_vm12, 4294967295, %v3758_v51  ;;  %vm1094_vm0 = vmxor %vm3010_vm11, %vm2031_vm2  ;;  %v1189_v39 = vmul.f32 %v3206_v22, %v3766_v12  ;;  %vm3767_vm11 = vcmp.eq.s32.totalorder %v2967_v5, 128  ;;  %v1244_v36 = vadd.f32 %v1243_v44, %v1188_v46  ;;  %v3773_v5 = vld [vmem:[#allocation27_spill] sm:$0xff]  ;;  %v3779_v44 = vld [vmem:[#allocation44_spill] sm:$0xff] }
 0x1ad   : > { %vm3214_vm8 = vmor %vm3762_vm13, %vm3761_vm14  ;;  %v3222_v59 = vsel %vm1094_vm0, 1.0, %v2032_v26  ;;  %vm3771_vm14 = vnez %v3711_v48 }
 0x1ae   : > { %vm1095_vm15 = vmxor %vm3765_vm9, %vm2031_vm2  ;;  %v1190_v19 = vmul.f32 %v3222_v59, %v3772_v14  ;;  %v1265_v21 = vadd.f32 %v1264_v4, %v1189_v39  ;;  %vm3774_vm9 = vnez %v3723_v30  ;;  %v3781_v4 = vld [vmem:[#allocation47_spill] sm:$0xff] }
 0x1af   : > { %vm3230_vm12 = vmor %vm3768_vm10, %vm3767_vm11  ;;  %v3238_v23 = vsel %vm1095_vm15, 1.0, %v2032_v26 }
 0x1b0   : > { %vm1096_vm13 = vmxor %vm3771_vm14, %vm2031_vm2  ;;  %v1191_v53 = vmul.f32 %v3238_v23, %v3773_v5  ;;  %v1245_v43 = vadd.f32 %v1244_v36, %v1190_v19  ;;  %v3782_v19 = vld [vmem:[#allocation9_spill] sm:$0xff]  ;;  %vm3785_vm14 = vnez %v3759_v51 }
 0x1b1   : > { %vm1097_vm0 = vmxor %vm3063_vm1, %vm2031_vm2  ;;  %v3246_v41 = vsel %vm1096_vm13, 1.0, %v2032_v26  ;;  %v1204_v28 = vmul.f32 %v2900_v32, %v3782_v19 }
 0x1b2   : > { %vm1098_vm15 = vmxor %vm3774_vm9, %vm2031_vm2  ;;  %v3254_v48 = vsel %vm1097_vm0, 1.0, %v2032_v26  ;;  %v1192_v16 = vmul.f32 %v3246_v41, %v3775_v31  ;;  %v1266_v58 = vadd.f32 %v1265_v21, %v1191_v53  ;;  %v3783_v53 = vld [vmem:[#allocation52_spill] sm:$0xff]  ;;  %v3784_v21 = vld [vmem:[#allocation11_spill] sm:$0xff] }
 0x1b3   : > { %vm1099_vm1 = vmxor %vm3097_vm4, %vm2031_vm2  ;;  %v3262_v2 = vsel %vm1098_vm15, 1.0, %v2032_v26  ;;  %v1193_v47 = vmul.f32 %v3254_v48, %v3776_v57  ;;  %v1205_v31 = vmul.f32 %v2919_v20, %v3784_v21  ;;  %v3787_v57 = vld [vmem:[#allocation13_spill] sm:$0xff] }
 0x1b4   : > { %vm1100_vm11 = vmxor %vm3114_vm5, %vm2031_vm2  ;;  %v3270_v30 = vsel %vm1099_vm1, 1.0, %v2032_v26  ;;  %v1194_v25 = vmul.f32 %v3262_v2, %v3777_v35  ;;  %v1246_v27 = vadd.f32 %v1245_v43, %v1192_v16  ;;  %v3786_v43 = vld [vmem:[#allocation56_spill] sm:$0xff]  ;;  %v3788_v35 = vld [vmem:[#allocation58_spill] sm:$0xff] }
 0x1b5   : > { %vm1101_vm4 = vmxor %vm3131_vm6, %vm2031_vm2  ;;  %v3278_v33 = vsel %vm1100_vm11, 1.0, %v2032_v26  ;;  %v1195_v29 = vmul.f32 %v3270_v30, %v3778_v63  ;;  %v1267_v46 = vadd.f32 %v1266_v58, %v1193_v47  ;;  %vm3780_vm6 = vnez %v3749_v42 }
 0x1b6   : > { %vm1102_vm5 = vmxor %vm3148_vm3, %vm2031_vm2  ;;  %v3286_v40 = vsel %vm1101_vm4, 1.0, %v2032_v26  ;;  %v1196_v12 = vmul.f32 %v3278_v33, %v3779_v44  ;;  %v1247_v39 = vadd.f32 %v1246_v27, %v1194_v25  ;;  %v1206_v47 = vmul.f32 %v2940_v37, %v3787_v57  ;;  %v3789_v25 = vld [vmem:[#allocation15_spill] sm:$0xff] }
 0x1b7   : > { %vm1103_vm10 = vmxor %vm3780_vm6, %vm2031_vm2  ;;  %v3294_v45 = vsel %vm1102_vm5, 1.0, %v2032_v26  ;;  %v1197_v14 = vmul.f32 %v3286_v40, %v3781_v4  ;;  %v1268_v36 = vadd.f32 %v1267_v46, %v1195_v29  ;;  %v1207_v27 = vmul.f32 %v2961_v50, %v3789_v25  ;;  %v3790_v29 = vld [vmem:[#allocation60_spill] sm:$0xff]  ;;  %v3791_v46 = vld [vmem:[#allocation17_spill] sm:$0xff] }
 0x1b8   : > { %vm1104_vm3 = vmxor %vm3182_vm7, %vm2031_vm2  ;;  %v3304_v5 = vsel %vm1103_vm10, 1.0, %v2032_v26  ;;  %v1198_v42 = vmul.f32 %v3294_v45, %v3783_v53  ;;  %v1248_v16 = vadd.f32 %v1247_v39, %v1196_v12  ;;  %v1208_v44 = vmul.f32 %v2982_v7, %v3791_v46  ;;  %v3792_v4 = vld [vmem:[#allocation62_spill] sm:$0xff] }
 0x1b9   : > { %vm1105_vm13 = vmxor %vm3785_vm14, %vm2031_vm2  ;;  %v3314_v32 = vsel %vm1104_vm3, 1.0, %v2032_v26  ;;  %v1199_v6 = vmul.f32 %v3304_v5, %v3786_v43  ;;  %v1269_v58 = vadd.f32 %v1268_v36, %v1197_v14  ;;  %v3793_v14 = vld [vmem:[#allocation19_spill] sm:$0xff]  ;;  %v3794_v36 = vld [vmem:[#allocation64_spill] sm:$0xff]  ;;  %v1304_v43 = vadd.f32 %v1206_v47, %v1204_v28 }
 0x1ba   : > { %vm1106_vm7 = vmxor %vm3214_vm8, %vm2031_vm2  ;;  %v3324_v20 = vsel %vm1105_vm13, 1.0, %v2032_v26  ;;  %v1200_v51 = vmul.f32 %v3314_v32, %v3788_v35  ;;  %v1249_v63 = vadd.f32 %v1248_v16, %v1198_v42  ;;  %v1209_v3 = vmul.f32 %v3000_v8, %v3793_v14  ;;  %v3795_v42 = vld [vmem:[#allocation23_spill] sm:$0xff]  ;;  %v3796_v7 = vld [vmem:[#allocation26_spill] sm:$0xff] }
 0x1bb   : > { %vm1107_vm0 = vmxor %vm3230_vm12, %vm2031_vm2  ;;  %v3334_v37 = vsel %vm1106_vm7, 1.0, %v2032_v26  ;;  %v1201_v15 = vmul.f32 %v3324_v20, %v3790_v29  ;;  %v1270_v12 = vadd.f32 %v1269_v58, %v1199_v6  ;;  %v1210_v21 = vmul.f32 %v3018_v13, %v3795_v42  ;;  %v3797_v58 = vld [vmem:[#allocation30_spill] sm:$0xff]  ;;  %v3798_v8 = vld [vmem:[#allocation33_spill] sm:$0xff] }
 0x1bc   : > { %v3341_v39 = vsel %vm1107_vm0, 1.0, %v2032_v26  ;;  %v1202_v50 = vmul.f32 %v3334_v37, %v3792_v4  ;;  %v1250_v19 = vadd.f32 %v1249_v63, %v1200_v51  ;;  %v1211_v6 = vmul.f32 %v3036_v62, %v3796_v7  ;;  %v3799_v4 = vld [vmem:[#allocation35_spill] sm:$0xff]  ;;  %v3800_v47 = vld [vmem:[#allocation38_spill] sm:$0xff] }
 0x1bd   : > { %v1203_v53 = vmul.f32 %v3341_v39, %v3794_v36  ;;  %v1271_v16 = vadd.f32 %v1270_v12, %v1201_v15  ;;  %v1325_v57 = vadd.f32 %v1207_v27, %v1205_v31  ;;  %v1212_v35 = vmul.f32 %v3054_v61, %v3797_v58  ;;  %v3801_v27 = vld [vmem:[#allocation41_spill] sm:$0xff] }
 0x1be   : > { %v1251_v26 = vadd.f32 %v1250_v19, %v1202_v50  ;;  %v1305_v29 = vadd.f32 %v1304_v43, %v1208_v44  ;;  %v1213_v51 = vmul.f32 %v3071_v56, %v3798_v8  ;;  %v1214_v13 = vmul.f32 %v3088_v38, %v3799_v4  ;;  %v3802_v56 = vld [vmem:[#allocation46_spill] sm:$0xff]  ;;  %v3803_v38 = vld [vmem:[#allocation49_spill] sm:$0xff]  ;;  %v3808_v4 = vld [vmem:[#allocation16_spill] sm:$0xff] }
 0x1bf   : > { %v1272_v25 = vadd.f32 %v1271_v16, %v1203_v53  ;;  %v1326_v46 = vadd.f32 %v1325_v57, %v1209_v3  ;;  %v1215_v62 = vmul.f32 %v3105_v18, %v3800_v47  ;;  %v1216_v61 = vmul.f32 %v3122_v17, %v3801_v27  ;;  %v3804_v18 = vld [vmem:[#allocation53_spill] sm:$0xff]  ;;  %v3805_v17 = vld [vmem:[#allocation10_spill] sm:$0xff] }
 0x1c0   : > { %v1252_v63 = vrot.slane %v1251_v26, 4  ;;  %v1306_v28 = vadd.f32 %v1305_v29, %v1210_v21  ;;  %v2033_v44 = vmov 1966171168   ;;  %v1217_v3 = vmul.f32 %v3139_v55, %v3802_v56 }
 0x1c1   : > { %v1273_v15 = vrot.slane %v1272_v25, 4  ;;  %v1327_v31 = vadd.f32 %v1326_v46, %v1211_v6  ;;  %v1283_v14 = vunpack.c.l.s4 %v2033_v44  ;;  %v1218_v42 = vmul.f32 %v3156_v49, %v3803_v38  ;;  %v3815_v38 = vld [vmem:[#allocation34_spill] sm:$0xff] }
 0x1c2   : > { %v1253_v12 = vadd.f32 %v1252_v63, %v1251_v26  ;;  %v1307_v19 = vadd.f32 %v1306_v28, %v1212_v35  ;;  %v1219_v43 = vmul.f32 %v3173_v0, %v3804_v18  ;;  %v1220_v26 = vmul.f32 %v3190_v1, %v3805_v17  ;;  %v3809_v28 = vld [vmem:[#allocation18_spill] sm:$0xff] }
 0x1c3   : > { %v1274_v50 = vadd.f32 %v1273_v15, %v1272_v25  ;;  %v1328_v53 = vadd.f32 %v1327_v31, %v1213_v51  ;;  %v1284_v58 = vunpack.c.0.s8 %v1283_v14  ;;  %v3806_v25 = vld [vmem:[#allocation12_spill] sm:$0xff]  ;;  %v3807_v51 = vld [vmem:[#allocation14_spill] sm:$0xff]  ;;  %v1223_v0 = vmul.f32 %v3238_v23, %v3808_v4 }
 0x1c4   : > { %v1254_v36 = vrot.slane %v1253_v12, 2  ;;  %v1308_v16 = vadd.f32 %v1307_v19, %v1214_v13  ;;  %v1221_v55 = vmul.f32 %v3206_v22, %v3806_v25  ;;  %v1222_v49 = vmul.f32 %v3222_v59, %v3807_v51  ;;  %v3811_v31 = vld [vmem:[#allocation20_spill] sm:$0xff]  ;;  %v3812_v59 = vld [vmem:[#allocation25_spill] sm:$0xff]  ;;  %v3818_v17 = vld [vmem:[#allocation42_spill] sm:$0xff] }
 0x1c5   : > { %v1275_v21 = vrot.slane %v1274_v50, 2  ;;  %v1329_v6 = vadd.f32 %v1328_v53, %v1215_v62  ;;  %v1224_v1 = vmul.f32 %v3246_v41, %v3809_v28  ;;  %v3810_v62 = vld [vmem:[#allocation65_spill] sm:$0xff]  ;;  %v1225_v27 = vmul.f32 %v3254_v48, %v3811_v31  ;;  %v3813_v23 = vld [vmem:[#allocation28_spill] sm:$0xff]  ;;  %v1236_v48 = vld [vmem:[%s2134_s10] sm:$0x3] }
 0x1c6   : > { %v1255_v7 = vadd.f32 %v1254_v36, %v1253_v12  ;;  %v1309_v35 = vadd.f32 %v1308_v16, %v1216_v61  ;;  %v1287_v12 = vsub.s32 %v1284_v58, %v3810_v62  ;;  %v1227_v19 = vmul.f32 %v3270_v30, %v3813_v23  ;;  %v3816_v16 = vld [vmem:[#allocation36_spill] sm:$0xff]  ;;  %v3820_v25 = vld [vmem:[#allocation51_spill] sm:$0xff] }
 0x1c7   : > { %v1276_v57 = vadd.f32 %v1275_v21, %v1274_v50  ;;  %v1330_v8 = vadd.f32 %v1329_v6, %v1217_v3  ;;  %v1226_v50 = vmul.f32 %v3262_v2, %v3812_v59  ;;  %v3814_v3 = vld [vmem:[#allocation32_spill] sm:$0xff]  ;;  %v1230_v2 = vmul.f32 %v3294_v45, %v3816_v16 }
 0x1c8   : > { %v1256_v29 = vrot.slane %v1255_v7, 1  ;;  %v1310_v46 = vadd.f32 %v1309_v35, %v1218_v42  ;;  %v1228_v41 = vmul.f32 %v3278_v33, %v3814_v3  ;;  %v1229_v42 = vmul.f32 %v3286_v40, %v3815_v38  ;;  %v3819_v58 = vld [vmem:[#allocation48_spill] sm:$0xff] }
 0x1c9   : > { %v1277_v63 = vrot.slane %v1276_v57, 1  ;;  %v1331_v15 = vadd.f32 %v1330_v8, %v1219_v43  ;;  %v1232_v33 = vmul.f32 %v3314_v32, %v3818_v17  ;;  %v1233_v35 = vmul.f32 %v3324_v20, %v3819_v58  ;;  %v3823_v8 = vld [vmem:[#allocation55_spill] sm:$0xff] }
 0x1ca   : > { %v1257_v13 = vadd.f32 %v1256_v29, %v1255_v7  ;;  %v1311_v22 = vadd.f32 %v1310_v46, %v1220_v26  ;;  %v3817_v7 = vld [vmem:[#allocation39_spill] sm:$0xff]  ;;  %v3821_v29 = vld [vmem:[#allocation8_spill] sm:$0xff] }
 0x1cb   : > { %v1278_v47 = vadd.f32 %v1277_v63, %v1276_v57  ;;  %v1332_v61 = vadd.f32 %v1331_v15, %v1221_v55  ;;  %v1231_v30 = vmul.f32 %v3304_v5, %v3817_v7  ;;  %v1234_v55 = vmul.f32 %v3334_v37, %v3820_v25 }
 0x1cc   : > { %v1312_v14 = vadd.f32 %v1311_v22, %v1222_v49  ;;  %vm3822_vm2 = vnez %v3821_v29  ;;  %v1235_v5 = vmul.f32 %v3341_v39, %v3823_v8 }
 0x1cd   : > { %v1281_v44 = vcombine.low %v1257_v13, %v1278_v47  ;;  %v1333_v56 = vadd.f32 %v1332_v61, %v1223_v0  ;;  %v1303_v61 = vld [vmem:[%s2140_s11] sm:$0x3] }
 0x1ce   : > { %v1313_v53 = vadd.f32 %v1312_v14, %v1224_v1 }
 0x1cf   : > { %v1288_v36 = vrot.slane %v1281_v44, %v1287_v12  ;;  %v1334_v21 = vadd.f32 %v1333_v56, %v1225_v27 }
 0x1d0   : > { %v1314_v43 = vadd.f32 %v1313_v53, %v1226_v50 }
 0x1d1   : > { %v1295_v18 = vrot.slane %v1288_v36, %v1287_v12  ;;  %v1335_v6 = vadd.f32 %v1334_v21, %v1227_v19 }
 0x1d2   : > { %v1315_v57 = vadd.f32 %v1314_v43, %v1228_v41 }
 0x1d3   : > { %v1297_v26 = vadd.f32 %v1295_v18, %v1236_v48  ;;  %v1336_v40 = vadd.f32 %v1335_v6, %v1229_v42 }
 0x1d4   : > { %v1316_v45 = vadd.f32 %v1315_v57, %v1230_v2 }
 0x1d5   : > { %1302 = vst.msk [vmem:[%s2134_s10] sm:$0x3] %vm3822_vm2, %v1297_v26  ;;  %v1337_v51 = vadd.f32 %v1336_v40, %v1231_v30 }
 0x1d6   : > { %v1317_v49 = vadd.f32 %v1316_v45, %v1232_v33 }
 0x1d7   : > { %v1338_v63 = vadd.f32 %v1337_v51, %v1233_v35 }
 0x1d8   : > { %v1318_v32 = vadd.f32 %v1317_v49, %v1234_v55 }
 0x1d9   : > { %v1339_v46 = vadd.f32 %v1338_v63, %v1235_v5 }
 0x1da   : > { %v1319_v4 = vrot.slane %v1318_v32, 4 }
 0x1db   : > { %v1340_v0 = vrot.slane %v1339_v46, 4 }
 0x1dc   : > { %v1320_v20 = vadd.f32 %v1319_v4, %v1318_v32 }
 0x1dd   : > { %v1341_v13 = vadd.f32 %v1340_v0, %v1339_v46 }
 0x1de   : > { %v1321_v15 = vrot.slane %v1320_v20, 2 }
 0x1df   : > { %v1342_v37 = vrot.slane %v1341_v13, 2 }
 0x1e0   : > { %v1322_v28 = vadd.f32 %v1321_v15, %v1320_v20 }
 0x1e1   : > { %v1343_v1 = vadd.f32 %v1342_v37, %v1341_v13 }
 0x1e2   : > { %v1323_v47 = vrot.slane %v1322_v28, 1 }
 0x1e3   : > { %v1344_v62 = vrot.slane %v1343_v1, 1 }
 0x1e4   : > { %v1324_v22 = vadd.f32 %v1323_v47, %v1322_v28 }
 0x1e5   : > { %v1345_v31 = vadd.f32 %v1344_v62, %v1343_v1 }
 0x1e7   : > { %v1348_v39 = vcombine.low %v1324_v22, %v1345_v31 }
 0x1e9   : > { %v1355_v27 = vrot.slane %v1348_v39, %v1287_v12 }
 0x1eb   : > { %v1362_v59 = vrot.slane %v1355_v27, %v1287_v12 }
 0x1ed   : > { %v1364_v50 = vadd.f32 %v1362_v59, %v1303_v61 }
 0x1ef   : > { %1365 = vst.msk [vmem:[%s2140_s11] sm:$0x3] %vm3822_vm2, %v1364_v50 }
 0x1f0 PF: > { %1368 = sbr.rel (%p2162_p4) target bundleno = 549 (0x225), region = 40  ;;  %v1370_v44 = vadd.f32 (!%p2162_p4), %v2298_v34, %v2267_v9  ;;  %v1391_v14 = vadd.f32 (!%p2162_p4), %v2323_v10, %v2279_v24  ;;  %v3824_v23 = vld [vmem:[#allocation9_spill] sm:$0xff] (!%p2162_p4)  ;;  %v3826_v3 = vld [vmem:[#allocation11_spill] sm:$0xff] (!%p2162_p4)  ;;  %v3831_v10 = vld [vmem:[#allocation26_spill] sm:$0xff] (!%p2162_p4) }
 0x1f1   : > { %v3825_v19 = vld [vmem:[#allocation13_spill] sm:$0xff] (!%p2162_p4)  ;;  %v3827_v41 = vld [vmem:[#allocation15_spill] sm:$0xff] (!%p2162_p4)  ;;  %v3834_v6 = vld [vmem:[#allocation30_spill] sm:$0xff] (!%p2162_p4) }
 0x1f2   : > { %v1437_v56 = vadd.f32 (!%p2162_p4), %v3825_v19, %v3824_v23  ;;  %v1458_v12 = vadd.f32 (!%p2162_p4), %v3827_v41, %v3826_v3  ;;  %v1371_v36 = vadd.f32 (!%p2162_p4), %v1370_v44, %v2334_v11  ;;  %v1392_v53 = vadd.f32 (!%p2162_p4), %v1391_v14, %v2345_v54  ;;  %v3828_v38 = vld [vmem:[#allocation17_spill] sm:$0xff] (!%p2162_p4)  ;;  %v3829_v48 = vld [vmem:[#allocation19_spill] sm:$0xff] (!%p2162_p4)  ;;  %v3836_v33 = vld [vmem:[#allocation50_spill] sm:$0xff] (!%p2162_p4) }
 0x1f3   : > { %v3830_v34 = vld [vmem:[#allocation23_spill] sm:$0xff] (!%p2162_p4)  ;;  %v3833_v7 = vld [vmem:[#allocation45_spill] sm:$0xff] (!%p2162_p4)  ;;  %v3837_v57 = vld [vmem:[#allocation54_spill] sm:$0xff] (!%p2162_p4) }
 0x1f4   : > { %v1438_v42 = vadd.f32 (!%p2162_p4), %v3828_v38, %v1437_v56  ;;  %v1459_v21 = vadd.f32 (!%p2162_p4), %v3829_v48, %v1458_v12  ;;  %v1372_v16 = vadd.f32 (!%p2162_p4), %v1371_v36, %v2374_v52  ;;  %v1393_v9 = vadd.f32 (!%p2162_p4), %v1392_v53, %v2399_v60  ;;  %v3832_v18 = vld [vmem:[#allocation43_spill] sm:$0xff] (!%p2162_p4)  ;;  %v3835_v17 = vld [vmem:[#allocation33_spill] sm:$0xff] (!%p2162_p4)  ;;  %v3839_v40 = vld [vmem:[#allocation38_spill] sm:$0xff] (!%p2162_p4) }
 0x1f5   : > { %v3838_v35 = vld [vmem:[#allocation35_spill] sm:$0xff] (!%p2162_p4)  ;;  %v3840_v25 = vld [vmem:[#allocation57_spill] sm:$0xff] (!%p2162_p4)  ;;  %v3843_v51 = vld [vmem:[#allocation46_spill] sm:$0xff] (!%p2162_p4) }
 0x1f6   : > { %v1439_v24 = vadd.f32 (!%p2162_p4), %v3830_v34, %v1438_v42  ;;  %v1460_v2 = vadd.f32 (!%p2162_p4), %v3831_v10, %v1459_v21  ;;  %v1373_v43 = vadd.f32 (!%p2162_p4), %v1372_v16, %v3832_v18  ;;  %v1394_v30 = vadd.f32 (!%p2162_p4), %v1393_v9, %v3833_v7  ;;  %v3841_v29 = vld [vmem:[#allocation59_spill] sm:$0xff] (!%p2162_p4)  ;;  %v3842_v8 = vld [vmem:[#allocation41_spill] sm:$0xff] (!%p2162_p4)  ;;  %v3849_v1 = vld [vmem:[#allocation22_spill] sm:$0xff] (!%p2162_p4) }
 0x1f7   : > { %v3844_v63 = vld [vmem:[#allocation61_spill] sm:$0xff]  ;;  %v3845_v46 = vld [vmem:[#allocation63_spill] sm:$0xff]  ;;  %v3850_v62 = vld [vmem:[#allocation10_spill] sm:$0xff] }
 0x1f8   : > { %v1440_v11 = vadd.f32 %v3834_v6, %v1439_v24  ;;  %v1461_v54 = vadd.f32 %v3835_v17, %v1460_v2  ;;  %v1374_v26 = vadd.f32 %v1373_v43, %v3836_v33  ;;  %v1395_v58 = vadd.f32 %v1394_v30, %v3837_v57  ;;  %v3846_v0 = vld [vmem:[#allocation49_spill] sm:$0xff]  ;;  %v3851_v31 = vld [vmem:[#allocation12_spill] sm:$0xff]  ;;  %v3853_v59 = vld [vmem:[#allocation27_spill] sm:$0xff] }
 0x1f9   : > { %v3847_v13 = vld [vmem:[#allocation53_spill] sm:$0xff]  ;;  %v3852_v27 = vld [vmem:[#allocation24_spill] sm:$0xff]  ;;  %v3854_v44 = vld [vmem:[#allocation14_spill] sm:$0xff] }
 0x1fa   : > { %v1441_v52 = vadd.f32 %v3838_v35, %v1440_v11  ;;  %v1462_v60 = vadd.f32 %v3839_v40, %v1461_v54  ;;  %v1375_v55 = vadd.f32 %v1374_v26, %v3840_v25  ;;  %v1396_v45 = vadd.f32 %v1395_v58, %v3841_v29  ;;  %v3848_v37 = vld [vmem:[#allocation21_spill] sm:$0xff]  ;;  %v3855_v23 = vld [vmem:[#allocation16_spill] sm:$0xff]  ;;  %v3857_v41 = vld [vmem:[#allocation31_spill] sm:$0xff] }
 0x1fb   : > { %v3856_v56 = vld [vmem:[#allocation29_spill] sm:$0xff]  ;;  %v3858_v36 = vld [vmem:[#allocation18_spill] sm:$0xff]  ;;  %v3859_v38 = vld [vmem:[#allocation20_spill] sm:$0xff] }
 0x1fc   : > { %v1442_v5 = vadd.f32 %v3842_v8, %v1441_v52  ;;  %v1463_v49 = vadd.f32 %v3843_v51, %v1462_v60  ;;  %v1376_v32 = vadd.f32 %v1375_v55, %v3844_v63  ;;  %v1397_v4 = vadd.f32 %v1396_v45, %v3845_v46  ;;  %v3860_v48 = vld [vmem:[#allocation37_spill] sm:$0xff]  ;;  %v3861_v16 = vld [vmem:[#allocation40_spill] sm:$0xff]  ;;  %v3865_v7 = vld [vmem:[#allocation47_spill] sm:$0xff] }
 0x1fd   : > { %v3862_v34 = vld [vmem:[#allocation25_spill] sm:$0xff]  ;;  %v3863_v10 = vld [vmem:[#allocation28_spill] sm:$0xff]  ;;  %v3867_v17 = vld [vmem:[#allocation34_spill] sm:$0xff] }
 0x1fe   : > { %v1443_v20 = vadd.f32 %v3846_v0, %v1442_v5  ;;  %v1464_v15 = vadd.f32 %v3847_v13, %v1463_v49  ;;  %v1377_v28 = vadd.f32 %v1376_v32, %v3848_v37  ;;  %v1398_v47 = vadd.f32 %v1397_v4, %v3849_v1  ;;  %v3864_v18 = vld [vmem:[#allocation44_spill] sm:$0xff]  ;;  %v3871_v40 = vld [vmem:[#allocation39_spill] sm:$0xff]  ;;  %v3872_v25 = vld [vmem:[#allocation58_spill] sm:$0xff] }
 0x1ff   : > { %v3866_v6 = vld [vmem:[#allocation32_spill] sm:$0xff]  ;;  %v3874_v8 = vld [vmem:[#allocation42_spill] sm:$0xff]  ;;  %v3878_v0 = vld [vmem:[#allocation51_spill] sm:$0xff] }
 0x200   : > { %v1444_v22 = vadd.f32 %v3850_v62, %v1443_v20  ;;  %v1465_v39 = vadd.f32 %v3851_v31, %v1464_v15  ;;  %v1378_v61 = vadd.f32 %v1377_v28, %v3852_v27  ;;  %v1399_v50 = vadd.f32 %v1398_v47, %v3853_v59  ;;  %v3868_v33 = vld [vmem:[#allocation52_spill] sm:$0xff]  ;;  %v3876_v63 = vld [vmem:[#allocation62_spill] sm:$0xff]  ;;  %v3879_v13 = vld [vmem:[#allocation55_spill] sm:$0xff] }
 0x201   : > { %v3869_v57 = vld [vmem:[#allocation56_spill] sm:$0xff]  ;;  %v2034_v31 = vmov 1966171168  }
 0x202   : > { %v1445_v14 = vadd.f32 %v3854_v44, %v1444_v22  ;;  %v1466_v19 = vadd.f32 %v3855_v23, %v1465_v39  ;;  %v1379_v3 = vadd.f32 %v1378_v61, %v3856_v56  ;;  %v1400_v12 = vadd.f32 %v1399_v50, %v3857_v41  ;;  %v3870_v35 = vld [vmem:[#allocation36_spill] sm:$0xff] }
 0x203   : > { %v3873_v29 = vld [vmem:[#allocation60_spill] sm:$0xff]  ;;  %v1416_v39 = vunpack.c.l.s4 %v2034_v31 }
 0x204   : > { %v1446_v53 = vadd.f32 %v3858_v36, %v1445_v14  ;;  %v1467_v42 = vadd.f32 %v3859_v38, %v1466_v19  ;;  %v1380_v21 = vadd.f32 %v1379_v3, %v3860_v48  ;;  %v1401_v9 = vadd.f32 %v1400_v12, %v3861_v16  ;;  %v3875_v51 = vld [vmem:[#allocation48_spill] sm:$0xff] }
 0x205   : > { %v3877_v46 = vld [vmem:[#allocation64_spill] sm:$0xff]  ;;  %v1417_v56 = vunpack.c.0.s8 %v1416_v39  ;;  %v3880_v3 = vlaneseq }
 0x206   : > { %v1447_v24 = vadd.f32 %v3862_v34, %v1446_v53  ;;  %v1468_v2 = vadd.f32 %v3863_v10, %v1467_v42  ;;  %v1381_v43 = vadd.f32 %v1380_v21, %v3864_v18  ;;  %v1402_v30 = vadd.f32 %v1401_v9, %v3865_v7 }
 0x207   : > { %v1419_v41 = vshrl.u32 %v3880_v3, 7 }
 0x208   : > { %v1448_v11 = vadd.f32 %v3866_v6, %v1447_v24  ;;  %v1469_v54 = vadd.f32 %v3867_v17, %v1468_v2  ;;  %v1382_v26 = vadd.f32 %v1381_v43, %v3868_v33  ;;  %v1403_v58 = vadd.f32 %v1402_v30, %v3869_v57  ;;  %v1369_v43 = vld [vmem:[%s2134_s10] sm:$0x3]  ;;  %v1436_v6 = vld [vmem:[%s2140_s11] sm:$0x3]  ;;  %v3881_v33 = vld [vmem:[#allocation8_spill] sm:$0xff] }
 0x209   : > { %v1420_v9 = vsub.s32 %v1417_v56, %v1419_v41  ;;  %vm3882_vm12 = vnez %v3881_v33 }
 0x20a   : > { %v1449_v52 = vadd.f32 %v3870_v35, %v1448_v11  ;;  %v1470_v60 = vadd.f32 %v3871_v40, %v1469_v54  ;;  %v1383_v55 = vadd.f32 %v1382_v26, %v3872_v25  ;;  %v1404_v45 = vadd.f32 %v1403_v58, %v3873_v29 }
 0x20c   : > { %v1450_v5 = vadd.f32 %v3874_v8, %v1449_v52  ;;  %v1471_v49 = vadd.f32 %v3875_v51, %v1470_v60  ;;  %v1384_v32 = vadd.f32 %v1383_v55, %v3876_v63  ;;  %v1405_v4 = vadd.f32 %v1404_v45, %v3877_v46 }
 0x20e   : > { %v1451_v20 = vadd.f32 %v3878_v0, %v1450_v5  ;;  %v1472_v15 = vadd.f32 %v3879_v13, %v1471_v49  ;;  %v1385_v37 = vrot.slane %v1384_v32, 4  ;;  %v1406_v28 = vrot.slane %v1405_v4, 4 }
 0x210   : > { %v1452_v1 = vrot.slane %v1451_v20, 4  ;;  %v1473_v47 = vrot.slane %v1472_v15, 4  ;;  %v1386_v62 = vadd.f32 %v1385_v37, %v1384_v32  ;;  %v1407_v22 = vadd.f32 %v1406_v28, %v1405_v4 }
 0x212   : > { %v1453_v27 = vadd.f32 %v1452_v1, %v1451_v20  ;;  %v1474_v61 = vadd.f32 %v1473_v47, %v1472_v15  ;;  %v1387_v59 = vrot.slane %v1386_v62, 2  ;;  %v1408_v50 = vrot.slane %v1407_v22, 2 }
 0x214   : > { %v1454_v44 = vrot.slane %v1453_v27, 2  ;;  %v1475_v14 = vrot.slane %v1474_v61, 2  ;;  %v1388_v23 = vadd.f32 %v1387_v59, %v1386_v62  ;;  %v1409_v19 = vadd.f32 %v1408_v50, %v1407_v22 }
 0x216   : > { %v1455_v12 = vadd.f32 %v1454_v44, %v1453_v27  ;;  %v1476_v36 = vadd.f32 %v1475_v14, %v1474_v61  ;;  %v1389_v53 = vrot.slane %v1388_v23, 1  ;;  %v1410_v38 = vrot.slane %v1409_v19, 1 }
 0x218   : > { %v1456_v42 = vrot.slane %v1455_v12, 1  ;;  %v1477_v48 = vrot.slane %v1476_v36, 1  ;;  %v1390_v21 = vadd.f32 %v1389_v53, %v1388_v23  ;;  %v1411_v16 = vadd.f32 %v1410_v38, %v1409_v19 }
 0x21a   : > { %v1457_v34 = vadd.f32 %v1456_v42, %v1455_v12  ;;  %v1478_v24 = vadd.f32 %v1477_v48, %v1476_v36  ;;  %v1414_v10 = vcombine.low %v1390_v21, %v1411_v16 }
 0x21c   : > { %v1481_v2 = vcombine.low %v1457_v34, %v1478_v24  ;;  %v1421_v18 = vrot.slane %v1414_v10, %v1420_v9 }
 0x21e   : > { %v1488_v7 = vrot.slane %v1481_v2, %v1420_v9  ;;  %v1428_v30 = vrot.slane %v1421_v18, %v1420_v9 }
 0x220   : > { %v1495_v11 = vrot.slane %v1488_v7, %v1420_v9  ;;  %v1430_v17 = vadd.f32 %v1428_v30, %v1369_v43 }
 0x222   : > { %v1497_v54 = vadd.f32 %v1495_v11, %v1436_v6  ;;  %1435 = vst.msk [vmem:[%s2134_s10] sm:$0x3] %vm3882_vm12, %v1430_v17 }
 0x224   : > { %1498 = vst.msk [vmem:[%s2140_s11] sm:$0x3] %vm3882_vm12, %v1497_v54 }
 0x225 PF: > { %s1767_s4 = sshll.u32 %s2019_s15, 5  ;;  %s1519_s8 = sshll.u32 %s2134_s10, 4  ;;  %s1520_s8 = int_to_ptr.vmem [resolvable:$true] %s1519_s8 }
 0x226   : > { %s3491_s7 = scalar_lea.hbm %s3562_s2, %s1767_s4  ;;  %s1500_s9 = scalar_lea.sflag [#allocation3], %s2113_s26 }
 0x227   : > { %s1917_s18 = scalar_lea.vmem %s1520_s8, 32  ;;  %p3883_p8 = scmp.ne.s32.totalorder %s3577_s22, 0 }
 0x228   : > { %p1918_p4 = scmp.ne.s32.totalorder %s1520_s8, %s1917_s18  ;;  %s2035_s19 = smov [#allocation2]  }
 0x229   : > { %s1921_s21 = sshll.u32 %s2035_s19, 4  ;;  %s1922_s21 = int_to_ptr.vmem [resolvable:$false] %s1921_s21 }
 0x22a   : > { %p1919_p12 = pnand %p1918_p4, %p3883_p8  ;;  %s1923_s23 = scalar_lea.vmem %s1922_s21, 64 }
 0x22b   : > { %p1924_p0 = scmp.lt.s32.totalorder %s1520_s8, %s1922_s21  ;;  %p1925_p1 = scmp.lt.s32.totalorder %s1923_s23, %s1917_s18 }
 0x22c   : > { %p1920_p13 = pneg %p1919_p12 }
 0x22d   : > { %p1926_p2 = por %p1925_p1, %p1924_p0 }
 0x22f   : > { %p1927_p3 = pnand %p1926_p2, %p1920_p13 }
 0x231   : > { %1930 = shalt.err (!%p1927_p3)
}
 0x232   : > { %s1931_s10 = scalar_lea.hbm %s3491_s7, 32  ;;  %s1935_s29 = scalar_lea.hbm %s3562_s2, 64 }
 0x233   : > { %p1932_p5 = scmp.ne.s32.totalorder %s3491_s7, %s1931_s10  ;;  %p1936_p9 = scmp.lt.u32.totalorder %s3491_s7, %s3562_s2 }
 0x234   : > { %p1937_p10 = scmp.lt.u32.totalorder %s1935_s29, %s1931_s10  ;;  %p1939_p4 = scmp.lt.u32.totalorder %s1931_s10, %s3491_s7 }
 0x235   : > { %p1933_p6 = pnand %p1932_p5, %p3883_p8 }
 0x236   : > { %p1938_p11 = por %p1937_p10, %p1936_p9 }
 0x237   : > { %p1934_p7 = pneg %p1933_p6 }
 0x238   : > { %p1940_p12 = por %p1939_p4, %p1938_p11 }
 0x23a   : > { %p1941_p13 = pnand %p1940_p12, %p1934_p7 }
 0x23c   : > { %1944 = shalt.err (!%p1941_p13)
}
 0x23d   : > { %1773 = dma.vmem_to_hbm [thread:$0]  (%p3883_p8), %s1520_s8, 32, %s3491_s7, %s1500_s9  }
 0x23e   : > { %s3517_s19 = scalar_lea.hbm %s3563_s3, %s1767_s4  ;;  %s1533_s21 = sshll.u32 %s2140_s11, 4  ;;  %s1534_s21 = int_to_ptr.vmem [resolvable:$true] %s1533_s21 }
 0x23f   : > { %s1505_s23 = scalar_lea.sflag [#allocation5], %s2113_s26  ;;  %s1945_s10 = scalar_lea.vmem %s1534_s21, 32 }
 0x240   : > { %p1946_p0 = scmp.ne.s32.totalorder %s1534_s21, %s1945_s10  ;;  %s2036_s27 = smov [#allocation4]  }
 0x241   : > { %s1949_s28 = sshll.u32 %s2036_s27, 4  ;;  %s1950_s28 = int_to_ptr.vmem [resolvable:$false] %s1949_s28 }
 0x242   : > { %p1947_p1 = pnand %p1946_p0, %p3883_p8  ;;  %s1951_s29 = scalar_lea.vmem %s1950_s28, 64 }
 0x243   : > { %p1952_p3 = scmp.lt.s32.totalorder %s1534_s21, %s1950_s28  ;;  %p1953_p5 = scmp.lt.s32.totalorder %s1951_s29, %s1945_s10 }
 0x244   : > { %p1948_p2 = pneg %p1947_p1 }
 0x245   : > { %p1954_p6 = por %p1953_p5, %p1952_p3 }
 0x247   : > { %p1955_p7 = pnand %p1954_p6, %p1948_p2 }
 0x249   : > { %1958 = shalt.err (!%p1955_p7)
}
 0x24a   : > { %s1959_s15 = scalar_lea.hbm %s3517_s19, 32  ;;  %s1963_s4 = scalar_lea.hbm %s3563_s3, 64 }
 0x24b   : > { %p1960_p9 = scmp.ne.s32.totalorder %s3517_s19, %s1959_s15  ;;  %p1964_p4 = scmp.lt.u32.totalorder %s3517_s19, %s3563_s3 }
 0x24c   : > { %p1965_p12 = scmp.lt.u32.totalorder %s1963_s4, %s1959_s15  ;;  %p1967_p0 = scmp.lt.u32.totalorder %s1959_s15, %s3517_s19 }
 0x24d   : > { %p1961_p10 = pnand %p1960_p9, %p3883_p8 }
 0x24e   : > { %p1966_p13 = por %p1965_p12, %p1964_p4 }
 0x24f   : > { %p1962_p11 = pneg %p1961_p10 }
 0x250   : > { %p1968_p1 = por %p1967_p0, %p1966_p13 }
 0x252   : > { %p1969_p2 = pnand %p1968_p1, %p1962_p11 }
 0x254   : > { %1972 = shalt.err (!%p1969_p2)
}
 0x255   : > { %1774 = dma.vmem_to_hbm [thread:$0]  (%p3883_p8), %s1534_s21, 32, %s3517_s19, %s1505_s23  }
 0x256 PF: > { %p1784_p3 = scmp.ge.s32.totalorder %s2027_s17, 2  ;;  %s1545_s9 = sand.u32 1, %s2007_s12  }
 0x257   : > { %p3884_p5 = scmp.ne.s32.totalorder %s3578_s24, 0  ;;  %s1546_s30 = scalar_lea.sflag [#allocation3], %s1545_s9 }
 0x259   : > { %p1778_p6 = pnand %p1784_p3, %p3884_p5 }
 0x25b   : > { %1998 = dma.done.wait (!%p1778_p6), %s1546_s30, 32  }
 0x25c   : > { %2000 = vsyncadd (!%p1778_p6), %s1546_s30, 4294967264  ;;  %s1555_s5 = scalar_lea.sflag [#allocation5], %s1545_s9 }
 0x25d   : > { %2002 = dma.done.wait (!%p1778_p6), %s1555_s5, 32  }
 0x25e   : > { %2004 = vsyncadd (!%p1778_p6), %s1555_s5, 4294967264  ;;  %s20_s17 = sadd.s32 1, %s2027_s17   ;;  %s3885_s12 = smov %s2011_s13 }
 0x25f   : > { %p17_p7 = scmp.ge.s32.totalorder %s20_s17, 4   ;;  %s3886_s13 = smov %s2015_s14 }
 0x260   : > { %s3887_s14 = smov %s2110_s25  ;;  %s3888_s15 = smov %s2023_s16 }
 0x261   : > { %s3889_s16 = smov %s3891_s20  ;;  %19 = sbr.rel (!%p17_p7) target bundleno = 6 (0x6), region = 92 }
 0x268   :  { %1560 = vsyncpa [#allocation3], 1 }
 0x269   :  { %1562 = vsyncpa [#allocation3 + $0x1], 1 }
 0x26a   :  { %1563 = vsyncpa [#allocation5], 1 }
 0x26b   :  { %1565 = vsyncpa [#allocation5 + $0x1], 1 }

</bundles_post_ra>
